<compile_context>
chip_gen: v7x
topology: tpu7x:2x2x1
jax: 0.10.0
libtpu: 0.0.40
codegen_flags: <defaults>
</compile_context>

<pallas_src>
import functools

import jax
import jax.numpy as jnp
from jax import lax
from jax.experimental import pallas as pl
from jax.experimental.pallas import tpu as pltpu

_LANE = 128
_SUB = 8
_NEG_BIG = -1e30   # padded-logit bias: exp underflows to 0, max unaffected


def _round_up(x, m):
    return (x + m - 1) // m * m


# ----------------------------------------------------------------------------
# Fused decoder kernel
#   refs = ids, emb, h0, [wih_l, whh_l, bih_l, bhn_l]*L, out_w, out_b,   (inputs)
#          logprobs, hn                                                  (outputs)
# ----------------------------------------------------------------------------
def _decoder_kernel(num_layers, seq_len, batch_p, hsz,
                    ids_ref, emb_ref, h0_ref, *refs):
    n_w = 4 * num_layers
    layer_refs = refs[:n_w]
    out_w_ref = refs[n_w]
    out_b_ref = refs[n_w + 1]
    logprobs_ref = refs[n_w + 2]
    hn_ref = refs[n_w + 3]

    H = hsz
    vocab = emb_ref.shape[0]
    sbp = seq_len * batch_p

    # --- Embedding gather as one-hot matmul + ReLU (MXU/VPU, no dynamic gather) -------
    ids = ids_ref[...]                                                # (SBp, 1) int32
    iota = lax.broadcasted_iota(jnp.int32, (sbp, vocab), 1)
    onehot = (ids == iota).astype(jnp.float32)                        # (SBp, V)
    x = jnp.maximum(
        jnp.dot(onehot, emb_ref[...], preferred_element_type=jnp.float32), 0.0)  # (SBp, E)

    # --- Load packed weights once; everything is tiny (<= (32, 128)) ------------------
    wih = [layer_refs[4 * l][...] for l in range(num_layers)]         # (Din, Gp)
    whh = [layer_refs[4 * l + 1][...] for l in range(num_layers)]     # (H,   Gp)
    bih = [layer_refs[4 * l + 2][...] for l in range(num_layers)]     # (1,   Gp)
    # Hoist broadcasts out of the unrolled loops (JAX does not CSE broadcast_in_dim).
    bhn = [jnp.broadcast_to(layer_refs[4 * l + 3][...], (batch_p, H))
           for l in range(num_layers)]                                # (Bp, H)
    bih_b = [jnp.broadcast_to(bih[l], (batch_p, bih[l].shape[1]))
             for l in range(num_layers)]                              # (Bp, Gp)

    # --- Layer-0 input projection hoisted over the whole sequence: one big matmul -----
    gi0 = jnp.dot(x, wih[0], preferred_element_type=jnp.float32) + bih[0]    # (SBp, Gp)

    def gru_cell(gi_t, h_prev, whh_l, bhn_l):
        # Packed gates in one 128-lane tile: cols [0:H)=r, [H:2H)=z, [2H:3H)=n.
        gh = jnp.dot(h_prev, whh_l, preferred_element_type=jnp.float32)      # (Bp, Gp)
        r = jax.nn.sigmoid(gi_t[:, :H] + gh[:, :H])
        z = jax.nn.sigmoid(gi_t[:, H:2 * H] + gh[:, H:2 * H])
        n = jnp.tanh(gi_t[:, 2 * H:3 * H] + r * (gh[:, 2 * H:3 * H] + bhn_l))
        return (1.0 - z) * n + z * h_prev                                    # stays in vregs

    h = [h0_ref[l] for l in range(num_layers)]                        # each (Bp, H)
    y0 = None
    # Wavefront: time-outer / layer-inner. Serial depth ~ S + L - 1 instead of S * L.
    for t in range(seq_len):
        gi_t = gi0[t * batch_p:(t + 1) * batch_p, :]                  # (Bp, Gp) pre-projected
        h[0] = gru_cell(gi_t, h[0], whh[0], bhn[0])
        y_t = h[0]
        for l in range(1, num_layers):
            gi_l = jnp.dot(y_t, wih[l], preferred_element_type=jnp.float32) + bih_b[l]
            h[l] = gru_cell(gi_l, h[l], whh[l], bhn[l])
            y_t = h[l]
        if t == 0:
            y0 = y_t                                                  # output[0] of last layer

    for l in range(num_layers):
        hn_ref[l] = h[l]

    # --- Linear + LogSoftmax(dim=1), lane-dense output (O padded to 128) --------------
    # Padded out_w columns are 0 and padded out_b lanes are -1e30, so padded logits
    # never affect the max nor the logsumexp.
    logits = (jnp.dot(y0, out_w_ref[...], preferred_element_type=jnp.float32)
              + out_b_ref[...])                                       # (Bp, Op)
    m = jnp.max(logits, axis=1, keepdims=True)
    s = logits - m
    lse = jnp.log(jnp.sum(jnp.exp(s), axis=1, keepdims=True))
    logprobs_ref[...] = s - lse


# ----------------------------------------------------------------------------
# One-time parameter repack: PyTorch layout -> packed, gate-fused kernel layout
# ----------------------------------------------------------------------------
def prepare_params(params, num_layers, hidden_size, embed_size):
    H = hidden_size
    Gp = _round_up(3 * H, _LANE)          # all 3 gates packed into one lane tile
    prep = {"embedding": jnp.asarray(params["embedding"], jnp.float32)}
    for l in range(num_layers):
        din = embed_size if l == 0 else H
        w_ih = jnp.asarray(params[f"w_ih_{l}"], jnp.float32)          # (3H, din)
        w_hh = jnp.asarray(params[f"w_hh_{l}"], jnp.float32)          # (3H, H)
        b_ih = jnp.asarray(params[f"b_ih_{l}"], jnp.float32)          # (3H,)
        b_hh = jnp.asarray(params[f"b_hh_{l}"], jnp.float32)          # (3H,)
        wih_p = jnp.zeros((din, Gp), jnp.float32)
        whh_p = jnp.zeros((H, Gp), jnp.float32)
        bih_p = jnp.zeros((1, Gp), jnp.float32)
        for g in range(3):                                            # gate order [r, z, n]
            wih_p = wih_p.at[:, g * H:(g + 1) * H].set(w_ih[g * H:(g + 1) * H, :].T)
            whh_p = whh_p.at[:, g * H:(g + 1) * H].set(w_hh[g * H:(g + 1) * H, :].T)
        # Fold b_hr, b_hz into the input-side bias (they add linearly); b_hn must stay
        # inside the r*(...) term, so it is kept separate and added per step.
        bih_p = bih_p.at[0, 0:H].set(b_ih[0:H] + b_hh[0:H])
        bih_p = bih_p.at[0, H:2 * H].set(b_ih[H:2 * H] + b_hh[H:2 * H])
        bih_p = bih_p.at[0, 2 * H:3 * H].set(b_ih[2 * H:3 * H])
        prep[f"wih_{l}"] = wih_p
        prep[f"whh_{l}"] = whh_p
        prep[f"bih_{l}"] = bih_p
        prep[f"bhn_{l}"] = b_hh[2 * H:3 * H].reshape(1, H)
    O = params["out_w"].shape[0]
    Op = _round_up(O, _LANE)
    prep["out_w"] = jnp.zeros((H, Op), jnp.float32).at[:, :O].set(
        jnp.asarray(params["out_w"], jnp.float32).T)
    prep["out_b"] = jnp.full((1, Op), _NEG_BIG, jnp.float32).at[0, :O].set(
        jnp.asarray(params["out_b"], jnp.float32))
    return prep


# ----------------------------------------------------------------------------
# Fused forward pass (single pallas_call, no grid — everything fits in VMEM)
# ----------------------------------------------------------------------------
@functools.partial(jax.jit, static_argnums=(3,))
def decoder_forward(prep, input_ids, hidden, num_layers):
    S, B = input_ids.shape
    _, _, H = hidden.shape
    O = prep["embedding"].shape[0]        # output_size == vocab size
    Op = prep["out_w"].shape[1]
    Bp = _round_up(B, _SUB)
    SBp = S * Bp

    # Cheap one-shot padding/flattening (plain XLA glue, negligible vs. the kernel).
    ids_p = jnp.zeros((S, Bp), jnp.int32).at[:, :B].set(input_ids.astype(jnp.int32))
    ids_flat = ids_p.reshape(SBp, 1)
    h0_p = jnp.zeros((num_layers, Bp, H), jnp.float32).at[:, :B, :].set(hidden)

    inputs = [ids_flat, prep["embedding"], h0_p]
    for l in range(num_layers):
        inputs += [prep[f"wih_{l}"], prep[f"whh_{l}"], prep[f"bih_{l}"], prep[f"bhn_{l}"]]
    inputs += [prep["out_w"], prep["out_b"]]

    vmem = pl.BlockSpec(memory_space=pltpu.MemorySpace.VMEM)
    kernel = functools.partial(_decoder_kernel, num_layers, S, Bp, H)
    logprobs_p, hn_p = pl.pallas_call(
        kernel,
        out_shape=(jax.ShapeDtypeStruct((Bp, Op), jnp.float32),
                   jax.ShapeDtypeStruct((num_layers, Bp, H), jnp.float32)),
        in_specs=[vmem] * len(inputs),
        out_specs=(vmem, vmem),
    )(*inputs)
    return logprobs_p[:B, :O], hn_p[:, :B, :]


# ----------------------------------------------------------------------------
# Pure-JAX reference (PyTorch semantics) for correctness checking
# ----------------------------------------------------------------------------
def decoder_forward_ref(params, input_ids, hidden, num_layers):
    emb = jnp.take(params["embedding"], input_ids, axis=0)
    x = jnp.maximum(emb, 0.0)
    S, _, _ = x.shape
    H = hidden.shape[-1]
    new_hidden = []
    for l in range(num_layers):
        w_ih, w_hh = params[f"w_ih_{l}"], params[f"w_hh_{l}"]
        b_ih, b_hh = params[f"b_ih_{l}"], params[f"b_hh_{l}"]
        h = hidden[l]
        ys = []
        for t in range(S):
            gi = x[t] @ w_ih.T + b_ih
            gh = h @ w_hh.T + b_hh
            i_r, i_z, i_n = gi[:, :H], gi[:, H:2 * H], gi[:, 2 * H:]
            h_r, h_z, h_n = gh[:, :H], gh[:, H:2 * H], gh[:, 2 * H:]
            r = jax.nn.sigmoid(i_r + h_r)
            z = jax.nn.sigmoid(i_z + h_z)
            n = jnp.tanh(i_n + r * h_n)
            h = (1.0 - z) * n + z * h
            ys.append(h)
        x = jnp.stack(ys, axis=0)
        new_hidden.append(h)
    logits = x[0] @ params["out_w"].T + params["out_b"]
    logprobs = jax.nn.log_softmax(logits, axis=1)
    return logprobs, jnp.stack(new_hidden, axis=0)


# ----------------------------------------------------------------------------
# Deterministic parameter init (shapes match nn.Embedding / nn.GRU / nn.Linear)
# ----------------------------------------------------------------------------
def init_params(key, hidden_size, output_size, embed_size, num_layers):
    params = {}
    k = 1.0 / jnp.sqrt(hidden_size)
    key, sub = jax.random.split(key)
    params["embedding"] = jax.random.normal(sub, (output_size, embed_size), jnp.float32)
    for l in range(num_layers):
        din = embed_size if l == 0 else hidden_size
        key, k1, k2, k3, k4 = jax.random.split(key, 5)
        params[f"w_ih_{l}"] = jax.random.uniform(k1, (3 * hidden_size, din), jnp.float32, -k, k)
        params[f"w_hh_{l}"] = jax.random.uniform(k2, (3 * hidden_size, hidden_size), jnp.float32, -k, k)
        params[f"b_ih_{l}"] = jax.random.uniform(k3, (3 * hidden_size,), jnp.float32, -k, k)
        params[f"b_hh_{l}"] = jax.random.uniform(k4, (3 * hidden_size,), jnp.float32, -k, k)
    key, k1, k2 = jax.random.split(key, 3)
    params["out_w"] = jax.random.uniform(k1, (output_size, hidden_size), jnp.float32, -k, k)
    params["out_b"] = jax.random.uniform(k2, (output_size,), jnp.float32, -k, k)
    return params


if __name__ == "__main__":
    HIDDEN, OUTPUT, EMBED, LAYERS = 32, 20, 16, 2
    SEQ, BATCH = 8, 2

    key = jax.random.PRNGKey(0)
    k_param, k_in, k_h = jax.random.split(key, 3)
    params = init_params(k_param, HIDDEN, OUTPUT, EMBED, LAYERS)
    input_ids = jax.random.randint(k_in, (SEQ, BATCH), 0, OUTPUT, dtype=jnp.int32)
    hidden = jax.random.normal(k_h, (LAYERS, BATCH, HIDDEN), dtype=jnp.float32)

    prep = prepare_params(params, LAYERS, HIDDEN, EMBED)          # one-time repack
    logprobs, new_hidden = decoder_forward(prep, input_ids, hidden, LAYERS)
    jax.block_until_ready((logprobs, new_hidden))

    ref_lp, ref_h = decoder_forward_ref(params, input_ids, hidden, LAYERS)
    assert logprobs.shape == (BATCH, OUTPUT)
    assert new_hidden.shape == (LAYERS, BATCH, HIDDEN)
    assert jnp.allclose(logprobs, ref_lp, atol=1e-3, rtol=1e-3)
    assert jnp.allclose(new_hidden, ref_h, atol=1e-3, rtol=1e-3)

    print("KERNEL_OK")
</pallas_src>

<mosaic_0001>
module attributes {stable_mosaic.version = 11 : i64} {
  func.func @_decoder_kernel(%arg0: memref<64x1xi32, #tpu.memory_space<vmem>>, %arg1: memref<20x16xf32, #tpu.memory_space<vmem>>, %arg2: memref<2x8x32xf32, #tpu.memory_space<vmem>>, %arg3: memref<16x128xf32, #tpu.memory_space<vmem>>, %arg4: memref<32x128xf32, #tpu.memory_space<vmem>>, %arg5: memref<1x128xf32, #tpu.memory_space<vmem>>, %arg6: memref<1x32xf32, #tpu.memory_space<vmem>>, %arg7: memref<32x128xf32, #tpu.memory_space<vmem>>, %arg8: memref<32x128xf32, #tpu.memory_space<vmem>>, %arg9: memref<1x128xf32, #tpu.memory_space<vmem>>, %arg10: memref<1x32xf32, #tpu.memory_space<vmem>>, %arg11: memref<32x128xf32, #tpu.memory_space<vmem>>, %arg12: memref<1x128xf32, #tpu.memory_space<vmem>>, %arg13: memref<8x128xf32, #tpu.memory_space<vmem>>, %arg14: memref<2x8x32xf32, #tpu.memory_space<vmem>>) attributes {dimension_semantics = [], scalar_prefetch = 0 : i64, scratch_operands = 0 : i64, tpu.core_type = #tpu.core_type<tc>} {
    %c0 = arith.constant 0 : index
    %c0_0 = arith.constant 0 : index
    %0 = vector.load %arg0[%c0, %c0_0] : memref<64x1xi32, #tpu.memory_space<vmem>>, vector<64x1xi32>
    %1 = tpu.iota {dimensions = array<i32: 1>} : vector<64x20xi32>
    %2 = vector.broadcast %0 : vector<64x1xi32> to vector<64x20xi32>
    %3 = arith.cmpi eq, %2, %1 : vector<64x20xi32>
    %4 = arith.extui %3 : vector<64x20xi1> to vector<64x20xi32>
    %5 = arith.sitofp %4 : vector<64x20xi32> to vector<64x20xf32>
    %c0_1 = arith.constant 0 : index
    %c0_2 = arith.constant 0 : index
    %6 = vector.load %arg1[%c0_1, %c0_2] : memref<20x16xf32, #tpu.memory_space<vmem>>, vector<20x16xf32>
    %cst = arith.constant dense<0.000000e+00> : vector<64x16xf32>
    %7 = tpu.matmul %5, %6, %cst {dimension_numbers = #tpu.dot_dimension_numbers<[1], [0], [0], [1], [0, 0, 1, 1], [], []>} : vector<64x20xf32>, vector<20x16xf32>, vector<64x16xf32> -> vector<64x16xf32>
    %cst_3 = arith.constant 0.000000e+00 : f32
    %8 = vector.broadcast %cst_3 : f32 to vector<64x16xf32>
    %9 = arith.maximumf %7, %8 : vector<64x16xf32>
    %c0_4 = arith.constant 0 : index
    %c0_5 = arith.constant 0 : index
    %10 = vector.load %arg3[%c0_4, %c0_5] : memref<16x128xf32, #tpu.memory_space<vmem>>, vector<16x128xf32>
    %c0_6 = arith.constant 0 : index
    %c0_7 = arith.constant 0 : index
    %11 = vector.load %arg7[%c0_6, %c0_7] : memref<32x128xf32, #tpu.memory_space<vmem>>, vector<32x128xf32>
    %c0_8 = arith.constant 0 : index
    %c0_9 = arith.constant 0 : index
    %12 = vector.load %arg4[%c0_8, %c0_9] : memref<32x128xf32, #tpu.memory_space<vmem>>, vector<32x128xf32>
    %c0_10 = arith.constant 0 : index
    %c0_11 = arith.constant 0 : index
    %13 = vector.load %arg8[%c0_10, %c0_11] : memref<32x128xf32, #tpu.memory_space<vmem>>, vector<32x128xf32>
    %c0_12 = arith.constant 0 : index
    %c0_13 = arith.constant 0 : index
    %14 = vector.load %arg5[%c0_12, %c0_13] : memref<1x128xf32, #tpu.memory_space<vmem>>, vector<1x128xf32>
    %c0_14 = arith.constant 0 : index
    %c0_15 = arith.constant 0 : index
    %15 = vector.load %arg9[%c0_14, %c0_15] : memref<1x128xf32, #tpu.memory_space<vmem>>, vector<1x128xf32>
    %c0_16 = arith.constant 0 : index
    %c0_17 = arith.constant 0 : index
    %16 = vector.load %arg6[%c0_16, %c0_17] : memref<1x32xf32, #tpu.memory_space<vmem>>, vector<1x32xf32>
    %17 = vector.shape_cast %16 : vector<1x32xf32> to vector<1x32xf32>
    %18 = vector.broadcast %17 : vector<1x32xf32> to vector<8x32xf32>
    %c0_18 = arith.constant 0 : index
    %c0_19 = arith.constant 0 : index
    %19 = vector.load %arg10[%c0_18, %c0_19] : memref<1x32xf32, #tpu.memory_space<vmem>>, vector<1x32xf32>
    %20 = vector.shape_cast %19 : vector<1x32xf32> to vector<1x32xf32>
    %21 = vector.broadcast %20 : vector<1x32xf32> to vector<8x32xf32>
    %22 = vector.shape_cast %15 : vector<1x128xf32> to vector<1x128xf32>
    %23 = vector.broadcast %22 : vector<1x128xf32> to vector<8x128xf32>
    %cst_20 = arith.constant dense<0.000000e+00> : vector<64x128xf32>
    %24 = tpu.matmul %9, %10, %cst_20 {dimension_numbers = #tpu.dot_dimension_numbers<[1], [0], [0], [1], [0, 0, 1, 1], [], []>} : vector<64x16xf32>, vector<16x128xf32>, vector<64x128xf32> -> vector<64x128xf32>
    %25 = vector.broadcast %14 : vector<1x128xf32> to vector<64x128xf32>
    %26 = arith.addf %24, %25 : vector<64x128xf32>
    %c0_21 = arith.constant 0 : index
    %c0_22 = arith.constant 0 : index
    %c0_23 = arith.constant 0 : index
    %27 = vector.load %arg2[%c0_21, %c0_22, %c0_23] : memref<2x8x32xf32, #tpu.memory_space<vmem>>, vector<1x8x32xf32>
    %28 = vector.shape_cast %27 : vector<1x8x32xf32> to vector<8x32xf32>
    %c1 = arith.constant 1 : index
    %c0_24 = arith.constant 0 : index
    %c0_25 = arith.constant 0 : index
    %29 = vector.load %arg2[%c1, %c0_24, %c0_25] : memref<2x8x32xf32, #tpu.memory_space<vmem>>, vector<1x8x32xf32>
    %30 = vector.shape_cast %29 : vector<1x8x32xf32> to vector<8x32xf32>
    %31 = vector.extract_strided_slice %26 {offsets = [0, 0], sizes = [8, 128], strides = [1, 1]} : vector<64x128xf32> to vector<8x128xf32>
    %cst_26 = arith.constant dense<0.000000e+00> : vector<8x128xf32>
    %32 = tpu.matmul %28, %12, %cst_26 {dimension_numbers = #tpu.dot_dimension_numbers<[1], [0], [0], [1], [0, 0, 1, 1], [], []>} : vector<8x32xf32>, vector<32x128xf32>, vector<8x128xf32> -> vector<8x128xf32>
    %33 = vector.extract_strided_slice %31 {offsets = [0, 0], sizes = [8, 32], strides = [1, 1]} : vector<8x128xf32> to vector<8x32xf32>
    %34 = vector.extract_strided_slice %32 {offsets = [0, 0], sizes = [8, 32], strides = [1, 1]} : vector<8x128xf32> to vector<8x32xf32>
    %35 = arith.addf %33, %34 : vector<8x32xf32>
    %36 = arith.negf %35 : vector<8x32xf32>
    %37 = math.exp %36 : vector<8x32xf32>
    %cst_27 = arith.constant 1.000000e+00 : f32
    %38 = vector.broadcast %cst_27 : f32 to vector<8x32xf32>
    %39 = arith.addf %38, %37 : vector<8x32xf32>
    %40 = arith.divf %38, %39 : vector<8x32xf32>
    %41 = vector.extract_strided_slice %31 {offsets = [0, 32], sizes = [8, 32], strides = [1, 1]} : vector<8x128xf32> to vector<8x32xf32>
    %42 = vector.extract_strided_slice %32 {offsets = [0, 32], sizes = [8, 32], strides = [1, 1]} : vector<8x128xf32> to vector<8x32xf32>
    %43 = arith.addf %41, %42 : vector<8x32xf32>
    %44 = arith.negf %43 : vector<8x32xf32>
    %45 = math.exp %44 : vector<8x32xf32>
    %cst_28 = arith.constant 1.000000e+00 : f32
    %46 = vector.broadcast %cst_28 : f32 to vector<8x32xf32>
    %47 = arith.addf %46, %45 : vector<8x32xf32>
    %48 = arith.divf %46, %47 : vector<8x32xf32>
    %49 = vector.extract_strided_slice %31 {offsets = [0, 64], sizes = [8, 32], strides = [1, 1]} : vector<8x128xf32> to vector<8x32xf32>
    %50 = vector.extract_strided_slice %32 {offsets = [0, 64], sizes = [8, 32], strides = [1, 1]} : vector<8x128xf32> to vector<8x32xf32>
    %51 = arith.addf %50, %18 : vector<8x32xf32>
    %52 = arith.mulf %40, %51 : vector<8x32xf32>
    %53 = arith.addf %49, %52 : vector<8x32xf32>
    %54 = math.tanh %53 : vector<8x32xf32>
    %cst_29 = arith.constant 1.000000e+00 : f32
    %55 = vector.broadcast %cst_29 : f32 to vector<8x32xf32>
    %56 = arith.subf %55, %48 : vector<8x32xf32>
    %57 = arith.mulf %56, %54 : vector<8x32xf32>
    %58 = arith.mulf %48, %28 : vector<8x32xf32>
    %59 = arith.addf %57, %58 : vector<8x32xf32>
    %cst_30 = arith.constant dense<0.000000e+00> : vector<8x128xf32>
    %60 = tpu.matmul %59, %11, %cst_30 {dimension_numbers = #tpu.dot_dimension_numbers<[1], [0], [0], [1], [0, 0, 1, 1], [], []>} : vector<8x32xf32>, vector<32x128xf32>, vector<8x128xf32> -> vector<8x128xf32>
    %61 = arith.addf %60, %23 : vector<8x128xf32>
    %cst_31 = arith.constant dense<0.000000e+00> : vector<8x128xf32>
    %62 = tpu.matmul %30, %13, %cst_31 {dimension_numbers = #tpu.dot_dimension_numbers<[1], [0], [0], [1], [0, 0, 1, 1], [], []>} : vector<8x32xf32>, vector<32x128xf32>, vector<8x128xf32> -> vector<8x128xf32>
    %63 = vector.extract_strided_slice %61 {offsets = [0, 0], sizes = [8, 32], strides = [1, 1]} : vector<8x128xf32> to vector<8x32xf32>
    %64 = vector.extract_strided_slice %62 {offsets = [0, 0], sizes = [8, 32], strides = [1, 1]} : vector<8x128xf32> to vector<8x32xf32>
    %65 = arith.addf %63, %64 : vector<8x32xf32>
    %66 = arith.negf %65 : vector<8x32xf32>
    %67 = math.exp %66 : vector<8x32xf32>
    %cst_32 = arith.constant 1.000000e+00 : f32
    %68 = vector.broadcast %cst_32 : f32 to vector<8x32xf32>
    %69 = arith.addf %68, %67 : vector<8x32xf32>
    %70 = arith.divf %68, %69 : vector<8x32xf32>
    %71 = vector.extract_strided_slice %61 {offsets = [0, 32], sizes = [8, 32], strides = [1, 1]} : vector<8x128xf32> to vector<8x32xf32>
    %72 = vector.extract_strided_slice %62 {offsets = [0, 32], sizes = [8, 32], strides = [1, 1]} : vector<8x128xf32> to vector<8x32xf32>
    %73 = arith.addf %71, %72 : vector<8x32xf32>
    %74 = arith.negf %73 : vector<8x32xf32>
    %75 = math.exp %74 : vector<8x32xf32>
    %cst_33 = arith.constant 1.000000e+00 : f32
    %76 = vector.broadcast %cst_33 : f32 to vector<8x32xf32>
    %77 = arith.addf %76, %75 : vector<8x32xf32>
    %78 = arith.divf %76, %77 : vector<8x32xf32>
    %79 = vector.extract_strided_slice %61 {offsets = [0, 64], sizes = [8, 32], strides = [1, 1]} : vector<8x128xf32> to vector<8x32xf32>
    %80 = vector.extract_strided_slice %62 {offsets = [0, 64], sizes = [8, 32], strides = [1, 1]} : vector<8x128xf32> to vector<8x32xf32>
    %81 = arith.addf %80, %21 : vector<8x32xf32>
    %82 = arith.mulf %70, %81 : vector<8x32xf32>
    %83 = arith.addf %79, %82 : vector<8x32xf32>
    %84 = math.tanh %83 : vector<8x32xf32>
    %cst_34 = arith.constant 1.000000e+00 : f32
    %85 = vector.broadcast %cst_34 : f32 to vector<8x32xf32>
    %86 = arith.subf %85, %78 : vector<8x32xf32>
    %87 = arith.mulf %86, %84 : vector<8x32xf32>
    %88 = arith.mulf %78, %30 : vector<8x32xf32>
    %89 = arith.addf %87, %88 : vector<8x32xf32>
    %90 = vector.extract_strided_slice %26 {offsets = [8, 0], sizes = [8, 128], strides = [1, 1]} : vector<64x128xf32> to vector<8x128xf32>
    %cst_35 = arith.constant dense<0.000000e+00> : vector<8x128xf32>
    %91 = tpu.matmul %59, %12, %cst_35 {dimension_numbers = #tpu.dot_dimension_numbers<[1], [0], [0], [1], [0, 0, 1, 1], [], []>} : vector<8x32xf32>, vector<32x128xf32>, vector<8x128xf32> -> vector<8x128xf32>
    %92 = vector.extract_strided_slice %90 {offsets = [0, 0], sizes = [8, 32], strides = [1, 1]} : vector<8x128xf32> to vector<8x32xf32>
    %93 = vector.extract_strided_slice %91 {offsets = [0, 0], sizes = [8, 32], strides = [1, 1]} : vector<8x128xf32> to vector<8x32xf32>
    %94 = arith.addf %92, %93 : vector<8x32xf32>
    %95 = arith.negf %94 : vector<8x32xf32>
    %96 = math.exp %95 : vector<8x32xf32>
    %cst_36 = arith.constant 1.000000e+00 : f32
    %97 = vector.broadcast %cst_36 : f32 to vector<8x32xf32>
    %98 = arith.addf %97, %96 : vector<8x32xf32>
    %99 = arith.divf %97, %98 : vector<8x32xf32>
    %100 = vector.extract_strided_slice %90 {offsets = [0, 32], sizes = [8, 32], strides = [1, 1]} : vector<8x128xf32> to vector<8x32xf32>
    %101 = vector.extract_strided_slice %91 {offsets = [0, 32], sizes = [8, 32], strides = [1, 1]} : vector<8x128xf32> to vector<8x32xf32>
    %102 = arith.addf %100, %101 : vector<8x32xf32>
    %103 = arith.negf %102 : vector<8x32xf32>
    %104 = math.exp %103 : vector<8x32xf32>
    %cst_37 = arith.constant 1.000000e+00 : f32
    %105 = vector.broadcast %cst_37 : f32 to vector<8x32xf32>
    %106 = arith.addf %105, %104 : vector<8x32xf32>
    %107 = arith.divf %105, %106 : vector<8x32xf32>
    %108 = vector.extract_strided_slice %90 {offsets = [0, 64], sizes = [8, 32], strides = [1, 1]} : vector<8x128xf32> to vector<8x32xf32>
    %109 = vector.extract_strided_slice %91 {offsets = [0, 64], sizes = [8, 32], strides = [1, 1]} : vector<8x128xf32> to vector<8x32xf32>
    %110 = arith.addf %109, %18 : vector<8x32xf32>
    %111 = arith.mulf %99, %110 : vector<8x32xf32>
    %112 = arith.addf %108, %111 : vector<8x32xf32>
    %113 = math.tanh %112 : vector<8x32xf32>
    %cst_38 = arith.constant 1.000000e+00 : f32
    %114 = vector.broadcast %cst_38 : f32 to vector<8x32xf32>
    %115 = arith.subf %114, %107 : vector<8x32xf32>
    %116 = arith.mulf %115, %113 : vector<8x32xf32>
    %117 = arith.mulf %107, %59 : vector<8x32xf32>
    %118 = arith.addf %116, %117 : vector<8x32xf32>
    %cst_39 = arith.constant dense<0.000000e+00> : vector<8x128xf32>
    %119 = tpu.matmul %118, %11, %cst_39 {dimension_numbers = #tpu.dot_dimension_numbers<[1], [0], [0], [1], [0, 0, 1, 1], [], []>} : vector<8x32xf32>, vector<32x128xf32>, vector<8x128xf32> -> vector<8x128xf32>
    %120 = arith.addf %119, %23 : vector<8x128xf32>
    %cst_40 = arith.constant dense<0.000000e+00> : vector<8x128xf32>
    %121 = tpu.matmul %89, %13, %cst_40 {dimension_numbers = #tpu.dot_dimension_numbers<[1], [0], [0], [1], [0, 0, 1, 1], [], []>} : vector<8x32xf32>, vector<32x128xf32>, vector<8x128xf32> -> vector<8x128xf32>
    %122 = vector.extract_strided_slice %120 {offsets = [0, 0], sizes = [8, 32], strides = [1, 1]} : vector<8x128xf32> to vector<8x32xf32>
    %123 = vector.extract_strided_slice %121 {offsets = [0, 0], sizes = [8, 32], strides = [1, 1]} : vector<8x128xf32> to vector<8x32xf32>
    %124 = arith.addf %122, %123 : vector<8x32xf32>
    %125 = arith.negf %124 : vector<8x32xf32>
    %126 = math.exp %125 : vector<8x32xf32>
    %cst_41 = arith.constant 1.000000e+00 : f32
    %127 = vector.broadcast %cst_41 : f32 to vector<8x32xf32>
    %128 = arith.addf %127, %126 : vector<8x32xf32>
    %129 = arith.divf %127, %128 : vector<8x32xf32>
    %130 = vector.extract_strided_slice %120 {offsets = [0, 32], sizes = [8, 32], strides = [1, 1]} : vector<8x128xf32> to vector<8x32xf32>
    %131 = vector.extract_strided_slice %121 {offsets = [0, 32], sizes = [8, 32], strides = [1, 1]} : vector<8x128xf32> to vector<8x32xf32>
    %132 = arith.addf %130, %131 : vector<8x32xf32>
    %133 = arith.negf %132 : vector<8x32xf32>
    %134 = math.exp %133 : vector<8x32xf32>
    %cst_42 = arith.constant 1.000000e+00 : f32
    %135 = vector.broadcast %cst_42 : f32 to vector<8x32xf32>
    %136 = arith.addf %135, %134 : vector<8x32xf32>
    %137 = arith.divf %135, %136 : vector<8x32xf32>
    %138 = vector.extract_strided_slice %120 {offsets = [0, 64], sizes = [8, 32], strides = [1, 1]} : vector<8x128xf32> to vector<8x32xf32>
    %139 = vector.extract_strided_slice %121 {offsets = [0, 64], sizes = [8, 32], strides = [1, 1]} : vector<8x128xf32> to vector<8x32xf32>
    %140 = arith.addf %139, %21 : vector<8x32xf32>
    %141 = arith.mulf %129, %140 : vector<8x32xf32>
    %142 = arith.addf %138, %141 : vector<8x32xf32>
    %143 = math.tanh %142 : vector<8x32xf32>
    %cst_43 = arith.constant 1.000000e+00 : f32
    %144 = vector.broadcast %cst_43 : f32 to vector<8x32xf32>
    %145 = arith.subf %144, %137 : vector<8x32xf32>
    %146 = arith.mulf %145, %143 : vector<8x32xf32>
    %147 = arith.mulf %137, %89 : vector<8x32xf32>
    %148 = arith.addf %146, %147 : vector<8x32xf32>
    %149 = vector.extract_strided_slice %26 {offsets = [16, 0], sizes = [8, 128], strides = [1, 1]} : vector<64x128xf32> to vector<8x128xf32>
    %cst_44 = arith.constant dense<0.000000e+00> : vector<8x128xf32>
    %150 = tpu.matmul %118, %12, %cst_44 {dimension_numbers = #tpu.dot_dimension_numbers<[1], [0], [0], [1], [0, 0, 1, 1], [], []>} : vector<8x32xf32>, vector<32x128xf32>, vector<8x128xf32> -> vector<8x128xf32>
    %151 = vector.extract_strided_slice %149 {offsets = [0, 0], sizes = [8, 32], strides = [1, 1]} : vector<8x128xf32> to vector<8x32xf32>
    %152 = vector.extract_strided_slice %150 {offsets = [0, 0], sizes = [8, 32], strides = [1, 1]} : vector<8x128xf32> to vector<8x32xf32>
    %153 = arith.addf %151, %152 : vector<8x32xf32>
    %154 = arith.negf %153 : vector<8x32xf32>
    %155 = math.exp %154 : vector<8x32xf32>
    %cst_45 = arith.constant 1.000000e+00 : f32
    %156 = vector.broadcast %cst_45 : f32 to vector<8x32xf32>
    %157 = arith.addf %156, %155 : vector<8x32xf32>
    %158 = arith.divf %156, %157 : vector<8x32xf32>
    %159 = vector.extract_strided_slice %149 {offsets = [0, 32], sizes = [8, 32], strides = [1, 1]} : vector<8x128xf32> to vector<8x32xf32>
    %160 = vector.extract_strided_slice %150 {offsets = [0, 32], sizes = [8, 32], strides = [1, 1]} : vector<8x128xf32> to vector<8x32xf32>
    %161 = arith.addf %159, %160 : vector<8x32xf32>
    %162 = arith.negf %161 : vector<8x32xf32>
    %163 = math.exp %162 : vector<8x32xf32>
    %cst_46 = arith.constant 1.000000e+00 : f32
    %164 = vector.broadcast %cst_46 : f32 to vector<8x32xf32>
    %165 = arith.addf %164, %163 : vector<8x32xf32>
    %166 = arith.divf %164, %165 : vector<8x32xf32>
    %167 = vector.extract_strided_slice %149 {offsets = [0, 64], sizes = [8, 32], strides = [1, 1]} : vector<8x128xf32> to vector<8x32xf32>
    %168 = vector.extract_strided_slice %150 {offsets = [0, 64], sizes = [8, 32], strides = [1, 1]} : vector<8x128xf32> to vector<8x32xf32>
    %169 = arith.addf %168, %18 : vector<8x32xf32>
    %170 = arith.mulf %158, %169 : vector<8x32xf32>
    %171 = arith.addf %167, %170 : vector<8x32xf32>
    %172 = math.tanh %171 : vector<8x32xf32>
    %cst_47 = arith.constant 1.000000e+00 : f32
    %173 = vector.broadcast %cst_47 : f32 to vector<8x32xf32>
    %174 = arith.subf %173, %166 : vector<8x32xf32>
    %175 = arith.mulf %174, %172 : vector<8x32xf32>
    %176 = arith.mulf %166, %118 : vector<8x32xf32>
    %177 = arith.addf %175, %176 : vector<8x32xf32>
    %cst_48 = arith.constant dense<0.000000e+00> : vector<8x128xf32>
    %178 = tpu.matmul %177, %11, %cst_48 {dimension_numbers = #tpu.dot_dimension_numbers<[1], [0], [0], [1], [0, 0, 1, 1], [], []>} : vector<8x32xf32>, vector<32x128xf32>, vector<8x128xf32> -> vector<8x128xf32>
    %179 = arith.addf %178, %23 : vector<8x128xf32>
    %cst_49 = arith.constant dense<0.000000e+00> : vector<8x128xf32>
    %180 = tpu.matmul %148, %13, %cst_49 {dimension_numbers = #tpu.dot_dimension_numbers<[1], [0], [0], [1], [0, 0, 1, 1], [], []>} : vector<8x32xf32>, vector<32x128xf32>, vector<8x128xf32> -> vector<8x128xf32>
    %181 = vector.extract_strided_slice %179 {offsets = [0, 0], sizes = [8, 32], strides = [1, 1]} : vector<8x128xf32> to vector<8x32xf32>
    %182 = vector.extract_strided_slice %180 {offsets = [0, 0], sizes = [8, 32], strides = [1, 1]} : vector<8x128xf32> to vector<8x32xf32>
    %183 = arith.addf %181, %182 : vector<8x32xf32>
    %184 = arith.negf %183 : vector<8x32xf32>
    %185 = math.exp %184 : vector<8x32xf32>
    %cst_50 = arith.constant 1.000000e+00 : f32
    %186 = vector.broadcast %cst_50 : f32 to vector<8x32xf32>
    %187 = arith.addf %186, %185 : vector<8x32xf32>
    %188 = arith.divf %186, %187 : vector<8x32xf32>
    %189 = vector.extract_strided_slice %179 {offsets = [0, 32], sizes = [8, 32], strides = [1, 1]} : vector<8x128xf32> to vector<8x32xf32>
    %190 = vector.extract_strided_slice %180 {offsets = [0, 32], sizes = [8, 32], strides = [1, 1]} : vector<8x128xf32> to vector<8x32xf32>
    %191 = arith.addf %189, %190 : vector<8x32xf32>
    %192 = arith.negf %191 : vector<8x32xf32>
    %193 = math.exp %192 : vector<8x32xf32>
    %cst_51 = arith.constant 1.000000e+00 : f32
    %194 = vector.broadcast %cst_51 : f32 to vector<8x32xf32>
    %195 = arith.addf %194, %193 : vector<8x32xf32>
    %196 = arith.divf %194, %195 : vector<8x32xf32>
    %197 = vector.extract_strided_slice %179 {offsets = [0, 64], sizes = [8, 32], strides = [1, 1]} : vector<8x128xf32> to vector<8x32xf32>
    %198 = vector.extract_strided_slice %180 {offsets = [0, 64], sizes = [8, 32], strides = [1, 1]} : vector<8x128xf32> to vector<8x32xf32>
    %199 = arith.addf %198, %21 : vector<8x32xf32>
    %200 = arith.mulf %188, %199 : vector<8x32xf32>
    %201 = arith.addf %197, %200 : vector<8x32xf32>
    %202 = math.tanh %201 : vector<8x32xf32>
    %cst_52 = arith.constant 1.000000e+00 : f32
    %203 = vector.broadcast %cst_52 : f32 to vector<8x32xf32>
    %204 = arith.subf %203, %196 : vector<8x32xf32>
    %205 = arith.mulf %204, %202 : vector<8x32xf32>
    %206 = arith.mulf %196, %148 : vector<8x32xf32>
    %207 = arith.addf %205, %206 : vector<8x32xf32>
    %208 = vector.extract_strided_slice %26 {offsets = [24, 0], sizes = [8, 128], strides = [1, 1]} : vector<64x128xf32> to vector<8x128xf32>
    %cst_53 = arith.constant dense<0.000000e+00> : vector<8x128xf32>
    %209 = tpu.matmul %177, %12, %cst_53 {dimension_numbers = #tpu.dot_dimension_numbers<[1], [0], [0], [1], [0, 0, 1, 1], [], []>} : vector<8x32xf32>, vector<32x128xf32>, vector<8x128xf32> -> vector<8x128xf32>
    %210 = vector.extract_strided_slice %208 {offsets = [0, 0], sizes = [8, 32], strides = [1, 1]} : vector<8x128xf32> to vector<8x32xf32>
    %211 = vector.extract_strided_slice %209 {offsets = [0, 0], sizes = [8, 32], strides = [1, 1]} : vector<8x128xf32> to vector<8x32xf32>
    %212 = arith.addf %210, %211 : vector<8x32xf32>
    %213 = arith.negf %212 : vector<8x32xf32>
    %214 = math.exp %213 : vector<8x32xf32>
    %cst_54 = arith.constant 1.000000e+00 : f32
    %215 = vector.broadcast %cst_54 : f32 to vector<8x32xf32>
    %216 = arith.addf %215, %214 : vector<8x32xf32>
    %217 = arith.divf %215, %216 : vector<8x32xf32>
    %218 = vector.extract_strided_slice %208 {offsets = [0, 32], sizes = [8, 32], strides = [1, 1]} : vector<8x128xf32> to vector<8x32xf32>
    %219 = vector.extract_strided_slice %209 {offsets = [0, 32], sizes = [8, 32], strides = [1, 1]} : vector<8x128xf32> to vector<8x32xf32>
    %220 = arith.addf %218, %219 : vector<8x32xf32>
    %221 = arith.negf %220 : vector<8x32xf32>
    %222 = math.exp %221 : vector<8x32xf32>
    %cst_55 = arith.constant 1.000000e+00 : f32
    %223 = vector.broadcast %cst_55 : f32 to vector<8x32xf32>
    %224 = arith.addf %223, %222 : vector<8x32xf32>
    %225 = arith.divf %223, %224 : vector<8x32xf32>
    %226 = vector.extract_strided_slice %208 {offsets = [0, 64], sizes = [8, 32], strides = [1, 1]} : vector<8x128xf32> to vector<8x32xf32>
    %227 = vector.extract_strided_slice %209 {offsets = [0, 64], sizes = [8, 32], strides = [1, 1]} : vector<8x128xf32> to vector<8x32xf32>
    %228 = arith.addf %227, %18 : vector<8x32xf32>
    %229 = arith.mulf %217, %228 : vector<8x32xf32>
    %230 = arith.addf %226, %229 : vector<8x32xf32>
    %231 = math.tanh %230 : vector<8x32xf32>
    %cst_56 = arith.constant 1.000000e+00 : f32
    %232 = vector.broadcast %cst_56 : f32 to vector<8x32xf32>
    %233 = arith.subf %232, %225 : vector<8x32xf32>
    %234 = arith.mulf %233, %231 : vector<8x32xf32>
    %235 = arith.mulf %225, %177 : vector<8x32xf32>
    %236 = arith.addf %234, %235 : vector<8x32xf32>
    %cst_57 = arith.constant dense<0.000000e+00> : vector<8x128xf32>
    %237 = tpu.matmul %236, %11, %cst_57 {dimension_numbers = #tpu.dot_dimension_numbers<[1], [0], [0], [1], [0, 0, 1, 1], [], []>} : vector<8x32xf32>, vector<32x128xf32>, vector<8x128xf32> -> vector<8x128xf32>
    %238 = arith.addf %237, %23 : vector<8x128xf32>
    %cst_58 = arith.constant dense<0.000000e+00> : vector<8x128xf32>
    %239 = tpu.matmul %207, %13, %cst_58 {dimension_numbers = #tpu.dot_dimension_numbers<[1], [0], [0], [1], [0, 0, 1, 1], [], []>} : vector<8x32xf32>, vector<32x128xf32>, vector<8x128xf32> -> vector<8x128xf32>
    %240 = vector.extract_strided_slice %238 {offsets = [0, 0], sizes = [8, 32], strides = [1, 1]} : vector<8x128xf32> to vector<8x32xf32>
    %241 = vector.extract_strided_slice %239 {offsets = [0, 0], sizes = [8, 32], strides = [1, 1]} : vector<8x128xf32> to vector<8x32xf32>
    %242 = arith.addf %240, %241 : vector<8x32xf32>
    %243 = arith.negf %242 : vector<8x32xf32>
    %244 = math.exp %243 : vector<8x32xf32>
    %cst_59 = arith.constant 1.000000e+00 : f32
    %245 = vector.broadcast %cst_59 : f32 to vector<8x32xf32>
    %246 = arith.addf %245, %244 : vector<8x32xf32>
    %247 = arith.divf %245, %246 : vector<8x32xf32>
    %248 = vector.extract_strided_slice %238 {offsets = [0, 32], sizes = [8, 32], strides = [1, 1]} : vector<8x128xf32> to vector<8x32xf32>
    %249 = vector.extract_strided_slice %239 {offsets = [0, 32], sizes = [8, 32], strides = [1, 1]} : vector<8x128xf32> to vector<8x32xf32>
    %250 = arith.addf %248, %249 : vector<8x32xf32>
    %251 = arith.negf %250 : vector<8x32xf32>
    %252 = math.exp %251 : vector<8x32xf32>
    %cst_60 = arith.constant 1.000000e+00 : f32
    %253 = vector.broadcast %cst_60 : f32 to vector<8x32xf32>
    %254 = arith.addf %253, %252 : vector<8x32xf32>
    %255 = arith.divf %253, %254 : vector<8x32xf32>
    %256 = vector.extract_strided_slice %238 {offsets = [0, 64], sizes = [8, 32], strides = [1, 1]} : vector<8x128xf32> to vector<8x32xf32>
    %257 = vector.extract_strided_slice %239 {offsets = [0, 64], sizes = [8, 32], strides = [1, 1]} : vector<8x128xf32> to vector<8x32xf32>
    %258 = arith.addf %257, %21 : vector<8x32xf32>
    %259 = arith.mulf %247, %258 : vector<8x32xf32>
    %260 = arith.addf %256, %259 : vector<8x32xf32>
    %261 = math.tanh %260 : vector<8x32xf32>
    %cst_61 = arith.constant 1.000000e+00 : f32
    %262 = vector.broadcast %cst_61 : f32 to vector<8x32xf32>
    %263 = arith.subf %262, %255 : vector<8x32xf32>
    %264 = arith.mulf %263, %261 : vector<8x32xf32>
    %265 = arith.mulf %255, %207 : vector<8x32xf32>
    %266 = arith.addf %264, %265 : vector<8x32xf32>
    %267 = vector.extract_strided_slice %26 {offsets = [32, 0], sizes = [8, 128], strides = [1, 1]} : vector<64x128xf32> to vector<8x128xf32>
    %cst_62 = arith.constant dense<0.000000e+00> : vector<8x128xf32>
    %268 = tpu.matmul %236, %12, %cst_62 {dimension_numbers = #tpu.dot_dimension_numbers<[1], [0], [0], [1], [0, 0, 1, 1], [], []>} : vector<8x32xf32>, vector<32x128xf32>, vector<8x128xf32> -> vector<8x128xf32>
    %269 = vector.extract_strided_slice %267 {offsets = [0, 0], sizes = [8, 32], strides = [1, 1]} : vector<8x128xf32> to vector<8x32xf32>
    %270 = vector.extract_strided_slice %268 {offsets = [0, 0], sizes = [8, 32], strides = [1, 1]} : vector<8x128xf32> to vector<8x32xf32>
    %271 = arith.addf %269, %270 : vector<8x32xf32>
    %272 = arith.negf %271 : vector<8x32xf32>
    %273 = math.exp %272 : vector<8x32xf32>
    %cst_63 = arith.constant 1.000000e+00 : f32
    %274 = vector.broadcast %cst_63 : f32 to vector<8x32xf32>
    %275 = arith.addf %274, %273 : vector<8x32xf32>
    %276 = arith.divf %274, %275 : vector<8x32xf32>
    %277 = vector.extract_strided_slice %267 {offsets = [0, 32], sizes = [8, 32], strides = [1, 1]} : vector<8x128xf32> to vector<8x32xf32>
    %278 = vector.extract_strided_slice %268 {offsets = [0, 32], sizes = [8, 32], strides = [1, 1]} : vector<8x128xf32> to vector<8x32xf32>
    %279 = arith.addf %277, %278 : vector<8x32xf32>
    %280 = arith.negf %279 : vector<8x32xf32>
    %281 = math.exp %280 : vector<8x32xf32>
    %cst_64 = arith.constant 1.000000e+00 : f32
    %282 = vector.broadcast %cst_64 : f32 to vector<8x32xf32>
    %283 = arith.addf %282, %281 : vector<8x32xf32>
    %284 = arith.divf %282, %283 : vector<8x32xf32>
    %285 = vector.extract_strided_slice %267 {offsets = [0, 64], sizes = [8, 32], strides = [1, 1]} : vector<8x128xf32> to vector<8x32xf32>
    %286 = vector.extract_strided_slice %268 {offsets = [0, 64], sizes = [8, 32], strides = [1, 1]} : vector<8x128xf32> to vector<8x32xf32>
    %287 = arith.addf %286, %18 : vector<8x32xf32>
    %288 = arith.mulf %276, %287 : vector<8x32xf32>
    %289 = arith.addf %285, %288 : vector<8x32xf32>
    %290 = math.tanh %289 : vector<8x32xf32>
    %cst_65 = arith.constant 1.000000e+00 : f32
    %291 = vector.broadcast %cst_65 : f32 to vector<8x32xf32>
    %292 = arith.subf %291, %284 : vector<8x32xf32>
    %293 = arith.mulf %292, %290 : vector<8x32xf32>
    %294 = arith.mulf %284, %236 : vector<8x32xf32>
    %295 = arith.addf %293, %294 : vector<8x32xf32>
    %cst_66 = arith.constant dense<0.000000e+00> : vector<8x128xf32>
    %296 = tpu.matmul %295, %11, %cst_66 {dimension_numbers = #tpu.dot_dimension_numbers<[1], [0], [0], [1], [0, 0, 1, 1], [], []>} : vector<8x32xf32>, vector<32x128xf32>, vector<8x128xf32> -> vector<8x128xf32>
    %297 = arith.addf %296, %23 : vector<8x128xf32>
    %cst_67 = arith.constant dense<0.000000e+00> : vector<8x128xf32>
    %298 = tpu.matmul %266, %13, %cst_67 {dimension_numbers = #tpu.dot_dimension_numbers<[1], [0], [0], [1], [0, 0, 1, 1], [], []>} : vector<8x32xf32>, vector<32x128xf32>, vector<8x128xf32> -> vector<8x128xf32>
    %299 = vector.extract_strided_slice %297 {offsets = [0, 0], sizes = [8, 32], strides = [1, 1]} : vector<8x128xf32> to vector<8x32xf32>
    %300 = vector.extract_strided_slice %298 {offsets = [0, 0], sizes = [8, 32], strides = [1, 1]} : vector<8x128xf32> to vector<8x32xf32>
    %301 = arith.addf %299, %300 : vector<8x32xf32>
    %302 = arith.negf %301 : vector<8x32xf32>
    %303 = math.exp %302 : vector<8x32xf32>
    %cst_68 = arith.constant 1.000000e+00 : f32
    %304 = vector.broadcast %cst_68 : f32 to vector<8x32xf32>
    %305 = arith.addf %304, %303 : vector<8x32xf32>
    %306 = arith.divf %304, %305 : vector<8x32xf32>
    %307 = vector.extract_strided_slice %297 {offsets = [0, 32], sizes = [8, 32], strides = [1, 1]} : vector<8x128xf32> to vector<8x32xf32>
    %308 = vector.extract_strided_slice %298 {offsets = [0, 32], sizes = [8, 32], strides = [1, 1]} : vector<8x128xf32> to vector<8x32xf32>
    %309 = arith.addf %307, %308 : vector<8x32xf32>
    %310 = arith.negf %309 : vector<8x32xf32>
    %311 = math.exp %310 : vector<8x32xf32>
    %cst_69 = arith.constant 1.000000e+00 : f32
    %312 = vector.broadcast %cst_69 : f32 to vector<8x32xf32>
    %313 = arith.addf %312, %311 : vector<8x32xf32>
    %314 = arith.divf %312, %313 : vector<8x32xf32>
    %315 = vector.extract_strided_slice %297 {offsets = [0, 64], sizes = [8, 32], strides = [1, 1]} : vector<8x128xf32> to vector<8x32xf32>
    %316 = vector.extract_strided_slice %298 {offsets = [0, 64], sizes = [8, 32], strides = [1, 1]} : vector<8x128xf32> to vector<8x32xf32>
    %317 = arith.addf %316, %21 : vector<8x32xf32>
    %318 = arith.mulf %306, %317 : vector<8x32xf32>
    %319 = arith.addf %315, %318 : vector<8x32xf32>
    %320 = math.tanh %319 : vector<8x32xf32>
    %cst_70 = arith.constant 1.000000e+00 : f32
    %321 = vector.broadcast %cst_70 : f32 to vector<8x32xf32>
    %322 = arith.subf %321, %314 : vector<8x32xf32>
    %323 = arith.mulf %322, %320 : vector<8x32xf32>
    %324 = arith.mulf %314, %266 : vector<8x32xf32>
    %325 = arith.addf %323, %324 : vector<8x32xf32>
    %326 = vector.extract_strided_slice %26 {offsets = [40, 0], sizes = [8, 128], strides = [1, 1]} : vector<64x128xf32> to vector<8x128xf32>
    %cst_71 = arith.constant dense<0.000000e+00> : vector<8x128xf32>
    %327 = tpu.matmul %295, %12, %cst_71 {dimension_numbers = #tpu.dot_dimension_numbers<[1], [0], [0], [1], [0, 0, 1, 1], [], []>} : vector<8x32xf32>, vector<32x128xf32>, vector<8x128xf32> -> vector<8x128xf32>
    %328 = vector.extract_strided_slice %326 {offsets = [0, 0], sizes = [8, 32], strides = [1, 1]} : vector<8x128xf32> to vector<8x32xf32>
    %329 = vector.extract_strided_slice %327 {offsets = [0, 0], sizes = [8, 32], strides = [1, 1]} : vector<8x128xf32> to vector<8x32xf32>
    %330 = arith.addf %328, %329 : vector<8x32xf32>
    %331 = arith.negf %330 : vector<8x32xf32>
    %332 = math.exp %331 : vector<8x32xf32>
    %cst_72 = arith.constant 1.000000e+00 : f32
    %333 = vector.broadcast %cst_72 : f32 to vector<8x32xf32>
    %334 = arith.addf %333, %332 : vector<8x32xf32>
    %335 = arith.divf %333, %334 : vector<8x32xf32>
    %336 = vector.extract_strided_slice %326 {offsets = [0, 32], sizes = [8, 32], strides = [1, 1]} : vector<8x128xf32> to vector<8x32xf32>
    %337 = vector.extract_strided_slice %327 {offsets = [0, 32], sizes = [8, 32], strides = [1, 1]} : vector<8x128xf32> to vector<8x32xf32>
    %338 = arith.addf %336, %337 : vector<8x32xf32>
    %339 = arith.negf %338 : vector<8x32xf32>
    %340 = math.exp %339 : vector<8x32xf32>
    %cst_73 = arith.constant 1.000000e+00 : f32
    %341 = vector.broadcast %cst_73 : f32 to vector<8x32xf32>
    %342 = arith.addf %341, %340 : vector<8x32xf32>
    %343 = arith.divf %341, %342 : vector<8x32xf32>
    %344 = vector.extract_strided_slice %326 {offsets = [0, 64], sizes = [8, 32], strides = [1, 1]} : vector<8x128xf32> to vector<8x32xf32>
    %345 = vector.extract_strided_slice %327 {offsets = [0, 64], sizes = [8, 32], strides = [1, 1]} : vector<8x128xf32> to vector<8x32xf32>
    %346 = arith.addf %345, %18 : vector<8x32xf32>
    %347 = arith.mulf %335, %346 : vector<8x32xf32>
    %348 = arith.addf %344, %347 : vector<8x32xf32>
    %349 = math.tanh %348 : vector<8x32xf32>
    %cst_74 = arith.constant 1.000000e+00 : f32
    %350 = vector.broadcast %cst_74 : f32 to vector<8x32xf32>
    %351 = arith.subf %350, %343 : vector<8x32xf32>
    %352 = arith.mulf %351, %349 : vector<8x32xf32>
    %353 = arith.mulf %343, %295 : vector<8x32xf32>
    %354 = arith.addf %352, %353 : vector<8x32xf32>
    %cst_75 = arith.constant dense<0.000000e+00> : vector<8x128xf32>
    %355 = tpu.matmul %354, %11, %cst_75 {dimension_numbers = #tpu.dot_dimension_numbers<[1], [0], [0], [1], [0, 0, 1, 1], [], []>} : vector<8x32xf32>, vector<32x128xf32>, vector<8x128xf32> -> vector<8x128xf32>
    %356 = arith.addf %355, %23 : vector<8x128xf32>
    %cst_76 = arith.constant dense<0.000000e+00> : vector<8x128xf32>
    %357 = tpu.matmul %325, %13, %cst_76 {dimension_numbers = #tpu.dot_dimension_numbers<[1], [0], [0], [1], [0, 0, 1, 1], [], []>} : vector<8x32xf32>, vector<32x128xf32>, vector<8x128xf32> -> vector<8x128xf32>
    %358 = vector.extract_strided_slice %356 {offsets = [0, 0], sizes = [8, 32], strides = [1, 1]} : vector<8x128xf32> to vector<8x32xf32>
    %359 = vector.extract_strided_slice %357 {offsets = [0, 0], sizes = [8, 32], strides = [1, 1]} : vector<8x128xf32> to vector<8x32xf32>
    %360 = arith.addf %358, %359 : vector<8x32xf32>
    %361 = arith.negf %360 : vector<8x32xf32>
    %362 = math.exp %361 : vector<8x32xf32>
    %cst_77 = arith.constant 1.000000e+00 : f32
    %363 = vector.broadcast %cst_77 : f32 to vector<8x32xf32>
    %364 = arith.addf %363, %362 : vector<8x32xf32>
    %365 = arith.divf %363, %364 : vector<8x32xf32>
    %366 = vector.extract_strided_slice %356 {offsets = [0, 32], sizes = [8, 32], strides = [1, 1]} : vector<8x128xf32> to vector<8x32xf32>
    %367 = vector.extract_strided_slice %357 {offsets = [0, 32], sizes = [8, 32], strides = [1, 1]} : vector<8x128xf32> to vector<8x32xf32>
    %368 = arith.addf %366, %367 : vector<8x32xf32>
    %369 = arith.negf %368 : vector<8x32xf32>
    %370 = math.exp %369 : vector<8x32xf32>
    %cst_78 = arith.constant 1.000000e+00 : f32
    %371 = vector.broadcast %cst_78 : f32 to vector<8x32xf32>
    %372 = arith.addf %371, %370 : vector<8x32xf32>
    %373 = arith.divf %371, %372 : vector<8x32xf32>
    %374 = vector.extract_strided_slice %356 {offsets = [0, 64], sizes = [8, 32], strides = [1, 1]} : vector<8x128xf32> to vector<8x32xf32>
    %375 = vector.extract_strided_slice %357 {offsets = [0, 64], sizes = [8, 32], strides = [1, 1]} : vector<8x128xf32> to vector<8x32xf32>
    %376 = arith.addf %375, %21 : vector<8x32xf32>
    %377 = arith.mulf %365, %376 : vector<8x32xf32>
    %378 = arith.addf %374, %377 : vector<8x32xf32>
    %379 = math.tanh %378 : vector<8x32xf32>
    %cst_79 = arith.constant 1.000000e+00 : f32
    %380 = vector.broadcast %cst_79 : f32 to vector<8x32xf32>
    %381 = arith.subf %380, %373 : vector<8x32xf32>
    %382 = arith.mulf %381, %379 : vector<8x32xf32>
    %383 = arith.mulf %373, %325 : vector<8x32xf32>
    %384 = arith.addf %382, %383 : vector<8x32xf32>
    %385 = vector.extract_strided_slice %26 {offsets = [48, 0], sizes = [8, 128], strides = [1, 1]} : vector<64x128xf32> to vector<8x128xf32>
    %cst_80 = arith.constant dense<0.000000e+00> : vector<8x128xf32>
    %386 = tpu.matmul %354, %12, %cst_80 {dimension_numbers = #tpu.dot_dimension_numbers<[1], [0], [0], [1], [0, 0, 1, 1], [], []>} : vector<8x32xf32>, vector<32x128xf32>, vector<8x128xf32> -> vector<8x128xf32>
    %387 = vector.extract_strided_slice %385 {offsets = [0, 0], sizes = [8, 32], strides = [1, 1]} : vector<8x128xf32> to vector<8x32xf32>
    %388 = vector.extract_strided_slice %386 {offsets = [0, 0], sizes = [8, 32], strides = [1, 1]} : vector<8x128xf32> to vector<8x32xf32>
    %389 = arith.addf %387, %388 : vector<8x32xf32>
    %390 = arith.negf %389 : vector<8x32xf32>
    %391 = math.exp %390 : vector<8x32xf32>
    %cst_81 = arith.constant 1.000000e+00 : f32
    %392 = vector.broadcast %cst_81 : f32 to vector<8x32xf32>
    %393 = arith.addf %392, %391 : vector<8x32xf32>
    %394 = arith.divf %392, %393 : vector<8x32xf32>
    %395 = vector.extract_strided_slice %385 {offsets = [0, 32], sizes = [8, 32], strides = [1, 1]} : vector<8x128xf32> to vector<8x32xf32>
    %396 = vector.extract_strided_slice %386 {offsets = [0, 32], sizes = [8, 32], strides = [1, 1]} : vector<8x128xf32> to vector<8x32xf32>
    %397 = arith.addf %395, %396 : vector<8x32xf32>
    %398 = arith.negf %397 : vector<8x32xf32>
    %399 = math.exp %398 : vector<8x32xf32>
    %cst_82 = arith.constant 1.000000e+00 : f32
    %400 = vector.broadcast %cst_82 : f32 to vector<8x32xf32>
    %401 = arith.addf %400, %399 : vector<8x32xf32>
    %402 = arith.divf %400, %401 : vector<8x32xf32>
    %403 = vector.extract_strided_slice %385 {offsets = [0, 64], sizes = [8, 32], strides = [1, 1]} : vector<8x128xf32> to vector<8x32xf32>
    %404 = vector.extract_strided_slice %386 {offsets = [0, 64], sizes = [8, 32], strides = [1, 1]} : vector<8x128xf32> to vector<8x32xf32>
    %405 = arith.addf %404, %18 : vector<8x32xf32>
    %406 = arith.mulf %394, %405 : vector<8x32xf32>
    %407 = arith.addf %403, %406 : vector<8x32xf32>
    %408 = math.tanh %407 : vector<8x32xf32>
    %cst_83 = arith.constant 1.000000e+00 : f32
    %409 = vector.broadcast %cst_83 : f32 to vector<8x32xf32>
    %410 = arith.subf %409, %402 : vector<8x32xf32>
    %411 = arith.mulf %410, %408 : vector<8x32xf32>
    %412 = arith.mulf %402, %354 : vector<8x32xf32>
    %413 = arith.addf %411, %412 : vector<8x32xf32>
    %cst_84 = arith.constant dense<0.000000e+00> : vector<8x128xf32>
    %414 = tpu.matmul %413, %11, %cst_84 {dimension_numbers = #tpu.dot_dimension_numbers<[1], [0], [0], [1], [0, 0, 1, 1], [], []>} : vector<8x32xf32>, vector<32x128xf32>, vector<8x128xf32> -> vector<8x128xf32>
    %415 = arith.addf %414, %23 : vector<8x128xf32>
    %cst_85 = arith.constant dense<0.000000e+00> : vector<8x128xf32>
    %416 = tpu.matmul %384, %13, %cst_85 {dimension_numbers = #tpu.dot_dimension_numbers<[1], [0], [0], [1], [0, 0, 1, 1], [], []>} : vector<8x32xf32>, vector<32x128xf32>, vector<8x128xf32> -> vector<8x128xf32>
    %417 = vector.extract_strided_slice %415 {offsets = [0, 0], sizes = [8, 32], strides = [1, 1]} : vector<8x128xf32> to vector<8x32xf32>
    %418 = vector.extract_strided_slice %416 {offsets = [0, 0], sizes = [8, 32], strides = [1, 1]} : vector<8x128xf32> to vector<8x32xf32>
    %419 = arith.addf %417, %418 : vector<8x32xf32>
    %420 = arith.negf %419 : vector<8x32xf32>
    %421 = math.exp %420 : vector<8x32xf32>
    %cst_86 = arith.constant 1.000000e+00 : f32
    %422 = vector.broadcast %cst_86 : f32 to vector<8x32xf32>
    %423 = arith.addf %422, %421 : vector<8x32xf32>
    %424 = arith.divf %422, %423 : vector<8x32xf32>
    %425 = vector.extract_strided_slice %415 {offsets = [0, 32], sizes = [8, 32], strides = [1, 1]} : vector<8x128xf32> to vector<8x32xf32>
    %426 = vector.extract_strided_slice %416 {offsets = [0, 32], sizes = [8, 32], strides = [1, 1]} : vector<8x128xf32> to vector<8x32xf32>
    %427 = arith.addf %425, %426 : vector<8x32xf32>
    %428 = arith.negf %427 : vector<8x32xf32>
    %429 = math.exp %428 : vector<8x32xf32>
    %cst_87 = arith.constant 1.000000e+00 : f32
    %430 = vector.broadcast %cst_87 : f32 to vector<8x32xf32>
    %431 = arith.addf %430, %429 : vector<8x32xf32>
    %432 = arith.divf %430, %431 : vector<8x32xf32>
    %433 = vector.extract_strided_slice %415 {offsets = [0, 64], sizes = [8, 32], strides = [1, 1]} : vector<8x128xf32> to vector<8x32xf32>
    %434 = vector.extract_strided_slice %416 {offsets = [0, 64], sizes = [8, 32], strides = [1, 1]} : vector<8x128xf32> to vector<8x32xf32>
    %435 = arith.addf %434, %21 : vector<8x32xf32>
    %436 = arith.mulf %424, %435 : vector<8x32xf32>
    %437 = arith.addf %433, %436 : vector<8x32xf32>
    %438 = math.tanh %437 : vector<8x32xf32>
    %cst_88 = arith.constant 1.000000e+00 : f32
    %439 = vector.broadcast %cst_88 : f32 to vector<8x32xf32>
    %440 = arith.subf %439, %432 : vector<8x32xf32>
    %441 = arith.mulf %440, %438 : vector<8x32xf32>
    %442 = arith.mulf %432, %384 : vector<8x32xf32>
    %443 = arith.addf %441, %442 : vector<8x32xf32>
    %444 = vector.extract_strided_slice %26 {offsets = [56, 0], sizes = [8, 128], strides = [1, 1]} : vector<64x128xf32> to vector<8x128xf32>
    %cst_89 = arith.constant dense<0.000000e+00> : vector<8x128xf32>
    %445 = tpu.matmul %413, %12, %cst_89 {dimension_numbers = #tpu.dot_dimension_numbers<[1], [0], [0], [1], [0, 0, 1, 1], [], []>} : vector<8x32xf32>, vector<32x128xf32>, vector<8x128xf32> -> vector<8x128xf32>
    %446 = vector.extract_strided_slice %444 {offsets = [0, 0], sizes = [8, 32], strides = [1, 1]} : vector<8x128xf32> to vector<8x32xf32>
    %447 = vector.extract_strided_slice %445 {offsets = [0, 0], sizes = [8, 32], strides = [1, 1]} : vector<8x128xf32> to vector<8x32xf32>
    %448 = arith.addf %446, %447 : vector<8x32xf32>
    %449 = arith.negf %448 : vector<8x32xf32>
    %450 = math.exp %449 : vector<8x32xf32>
    %cst_90 = arith.constant 1.000000e+00 : f32
    %451 = vector.broadcast %cst_90 : f32 to vector<8x32xf32>
    %452 = arith.addf %451, %450 : vector<8x32xf32>
    %453 = arith.divf %451, %452 : vector<8x32xf32>
    %454 = vector.extract_strided_slice %444 {offsets = [0, 32], sizes = [8, 32], strides = [1, 1]} : vector<8x128xf32> to vector<8x32xf32>
    %455 = vector.extract_strided_slice %445 {offsets = [0, 32], sizes = [8, 32], strides = [1, 1]} : vector<8x128xf32> to vector<8x32xf32>
    %456 = arith.addf %454, %455 : vector<8x32xf32>
    %457 = arith.negf %456 : vector<8x32xf32>
    %458 = math.exp %457 : vector<8x32xf32>
    %cst_91 = arith.constant 1.000000e+00 : f32
    %459 = vector.broadcast %cst_91 : f32 to vector<8x32xf32>
    %460 = arith.addf %459, %458 : vector<8x32xf32>
    %461 = arith.divf %459, %460 : vector<8x32xf32>
    %462 = vector.extract_strided_slice %444 {offsets = [0, 64], sizes = [8, 32], strides = [1, 1]} : vector<8x128xf32> to vector<8x32xf32>
    %463 = vector.extract_strided_slice %445 {offsets = [0, 64], sizes = [8, 32], strides = [1, 1]} : vector<8x128xf32> to vector<8x32xf32>
    %464 = arith.addf %463, %18 : vector<8x32xf32>
    %465 = arith.mulf %453, %464 : vector<8x32xf32>
    %466 = arith.addf %462, %465 : vector<8x32xf32>
    %467 = math.tanh %466 : vector<8x32xf32>
    %cst_92 = arith.constant 1.000000e+00 : f32
    %468 = vector.broadcast %cst_92 : f32 to vector<8x32xf32>
    %469 = arith.subf %468, %461 : vector<8x32xf32>
    %470 = arith.mulf %469, %467 : vector<8x32xf32>
    %471 = arith.mulf %461, %413 : vector<8x32xf32>
    %472 = arith.addf %470, %471 : vector<8x32xf32>
    %cst_93 = arith.constant dense<0.000000e+00> : vector<8x128xf32>
    %473 = tpu.matmul %472, %11, %cst_93 {dimension_numbers = #tpu.dot_dimension_numbers<[1], [0], [0], [1], [0, 0, 1, 1], [], []>} : vector<8x32xf32>, vector<32x128xf32>, vector<8x128xf32> -> vector<8x128xf32>
    %474 = arith.addf %473, %23 : vector<8x128xf32>
    %cst_94 = arith.constant dense<0.000000e+00> : vector<8x128xf32>
    %475 = tpu.matmul %443, %13, %cst_94 {dimension_numbers = #tpu.dot_dimension_numbers<[1], [0], [0], [1], [0, 0, 1, 1], [], []>} : vector<8x32xf32>, vector<32x128xf32>, vector<8x128xf32> -> vector<8x128xf32>
    %476 = vector.extract_strided_slice %474 {offsets = [0, 0], sizes = [8, 32], strides = [1, 1]} : vector<8x128xf32> to vector<8x32xf32>
    %477 = vector.extract_strided_slice %475 {offsets = [0, 0], sizes = [8, 32], strides = [1, 1]} : vector<8x128xf32> to vector<8x32xf32>
    %478 = arith.addf %476, %477 : vector<8x32xf32>
    %479 = arith.negf %478 : vector<8x32xf32>
    %480 = math.exp %479 : vector<8x32xf32>
    %cst_95 = arith.constant 1.000000e+00 : f32
    %481 = vector.broadcast %cst_95 : f32 to vector<8x32xf32>
    %482 = arith.addf %481, %480 : vector<8x32xf32>
    %483 = arith.divf %481, %482 : vector<8x32xf32>
    %484 = vector.extract_strided_slice %474 {offsets = [0, 32], sizes = [8, 32], strides = [1, 1]} : vector<8x128xf32> to vector<8x32xf32>
    %485 = vector.extract_strided_slice %475 {offsets = [0, 32], sizes = [8, 32], strides = [1, 1]} : vector<8x128xf32> to vector<8x32xf32>
    %486 = arith.addf %484, %485 : vector<8x32xf32>
    %487 = arith.negf %486 : vector<8x32xf32>
    %488 = math.exp %487 : vector<8x32xf32>
    %cst_96 = arith.constant 1.000000e+00 : f32
    %489 = vector.broadcast %cst_96 : f32 to vector<8x32xf32>
    %490 = arith.addf %489, %488 : vector<8x32xf32>
    %491 = arith.divf %489, %490 : vector<8x32xf32>
    %492 = vector.extract_strided_slice %474 {offsets = [0, 64], sizes = [8, 32], strides = [1, 1]} : vector<8x128xf32> to vector<8x32xf32>
    %493 = vector.extract_strided_slice %475 {offsets = [0, 64], sizes = [8, 32], strides = [1, 1]} : vector<8x128xf32> to vector<8x32xf32>
    %494 = arith.addf %493, %21 : vector<8x32xf32>
    %495 = arith.mulf %483, %494 : vector<8x32xf32>
    %496 = arith.addf %492, %495 : vector<8x32xf32>
    %497 = math.tanh %496 : vector<8x32xf32>
    %cst_97 = arith.constant 1.000000e+00 : f32
    %498 = vector.broadcast %cst_97 : f32 to vector<8x32xf32>
    %499 = arith.subf %498, %491 : vector<8x32xf32>
    %500 = arith.mulf %499, %497 : vector<8x32xf32>
    %501 = arith.mulf %491, %443 : vector<8x32xf32>
    %502 = arith.addf %500, %501 : vector<8x32xf32>
    %c0_98 = arith.constant 0 : index
    %c0_99 = arith.constant 0 : index
    %c0_100 = arith.constant 0 : index
    %503 = vector.load %arg14[%c0_98, %c0_99, %c0_100] : memref<2x8x32xf32, #tpu.memory_space<vmem>>, vector<1x8x32xf32>
    %504 = vector.shape_cast %503 : vector<1x8x32xf32> to vector<8x32xf32>
    %505 = vector.shape_cast %472 : vector<8x32xf32> to vector<1x8x32xf32>
    tpu.vector_store %arg14[%c0_98, %c0_99, %c0_100], %505 {strides = array<i32>} : memref<2x8x32xf32, #tpu.memory_space<vmem>>, vector<1x8x32xf32>,
    %c1_101 = arith.constant 1 : index
    %c0_102 = arith.constant 0 : index
    %c0_103 = arith.constant 0 : index
    %506 = vector.load %arg14[%c1_101, %c0_102, %c0_103] : memref<2x8x32xf32, #tpu.memory_space<vmem>>, vector<1x8x32xf32>
    %507 = vector.shape_cast %506 : vector<1x8x32xf32> to vector<8x32xf32>
    %508 = vector.shape_cast %502 : vector<8x32xf32> to vector<1x8x32xf32>
    tpu.vector_store %arg14[%c1_101, %c0_102, %c0_103], %508 {strides = array<i32>} : memref<2x8x32xf32, #tpu.memory_space<vmem>>, vector<1x8x32xf32>,
    %c0_104 = arith.constant 0 : index
    %c0_105 = arith.constant 0 : index
    %509 = vector.load %arg11[%c0_104, %c0_105] : memref<32x128xf32, #tpu.memory_space<vmem>>, vector<32x128xf32>
    %cst_106 = arith.constant dense<0.000000e+00> : vector<8x128xf32>
    %510 = tpu.matmul %89, %509, %cst_106 {dimension_numbers = #tpu.dot_dimension_numbers<[1], [0], [0], [1], [0, 0, 1, 1], [], []>} : vector<8x32xf32>, vector<32x128xf32>, vector<8x128xf32> -> vector<8x128xf32>
    %c0_107 = arith.constant 0 : index
    %c0_108 = arith.constant 0 : index
    %511 = vector.load %arg12[%c0_107, %c0_108] : memref<1x128xf32, #tpu.memory_space<vmem>>, vector<1x128xf32>
    %512 = vector.broadcast %511 : vector<1x128xf32> to vector<8x128xf32>
    %513 = arith.addf %510, %512 : vector<8x128xf32>
    %cst_109 = arith.constant dense<0xFF800000> : vector<8xf32>
    %514 = vector.multi_reduction <maximumf>, %513, %cst_109 [1] : vector<8x128xf32> to vector<8xf32>
    %515 = vector.shape_cast %514 : vector<8xf32> to vector<8x1xf32>
    %516 = vector.broadcast %515 : vector<8x1xf32> to vector<8x128xf32>
    %517 = arith.subf %513, %516 : vector<8x128xf32>
    %518 = math.exp %517 : vector<8x128xf32>
    %cst_110 = arith.constant dense<0.000000e+00> : vector<8xf32>
    %519 = vector.multi_reduction <add>, %518, %cst_110 [1] : vector<8x128xf32> to vector<8xf32>
    %520 = vector.shape_cast %519 : vector<8xf32> to vector<8x1xf32>
    %521 = math.log %520 : vector<8x1xf32>
    %522 = vector.broadcast %521 : vector<8x1xf32> to vector<8x128xf32>
    %523 = arith.subf %517, %522 : vector<8x128xf32>
    %c0_111 = arith.constant 0 : index
    %c0_112 = arith.constant 0 : index
    %524 = vector.load %arg13[%c0_111, %c0_112] : memref<8x128xf32, #tpu.memory_space<vmem>>, vector<8x128xf32>
    tpu.vector_store %arg13[%c0_111, %c0_112], %523 {strides = array<i32>} : memref<8x128xf32, #tpu.memory_space<vmem>>, vector<8x128xf32>,
    return
  }
}

</mosaic_0001>

<bundles_post_ra>
// kernel: decoder_forward.1
= control target key start
LH: loop header
LB: loop body
LE: loop exit
PB: predicated region body
PF: predicated region fallthrough
CT: control target
= control target key end

     0   :  { %v3532_v0 = vmov 0   ;;  %vm132_vm0 = vcmask 1043456   ;;  %v54_v13 = vlaneseq  ;;  %vm107_vm1 = vcmask 162816   ;;  %s3536_s23 = smov 64   ;;  %s4130_s0 = inlined_call_operand.vmem [shape: s32[64,1], index: 0, kind: input, shape index: {}]   ;;  %s4131_s1 = inlined_call_operand.vmem [shape: f32[20,16], index: 1, kind: input, shape index: {}]   ;;  %s4132_s3 = inlined_call_operand.vmem [shape: f32[16,128], index: 3, kind: input, shape index: {}]   ;;  %s4133_s6 = inlined_call_operand.vmem [shape: f32[1,32], index: 6, kind: input, shape index: {}]   ;;  %s4134_s4 = inlined_call_operand.vmem [shape: f32[32,128], index: 4, kind: input, shape index: {}]   ;;  %s4135_s2 = inlined_call_operand.vmem [shape: f32[2,8,32], index: 2, kind: input, shape index: {}]   ;;  %s4136_s5 = inlined_call_operand.vmem [shape: f32[1,128], index: 5, kind: input, shape index: {}]   ;;  %s4137_s8 = inlined_call_operand.vmem [shape: f32[32,128], index: 8, kind: input, shape index: {}]   ;;  %s4138_s7 = inlined_call_operand.vmem [shape: f32[32,128], index: 7, kind: input, shape index: {}]   ;;  %s4139_s10 = inlined_call_operand.vmem [shape: f32[1,32], index: 10, kind: input, shape index: {}]   ;;  %s4140_s9 = inlined_call_operand.vmem [shape: f32[1,128], index: 9, kind: input, shape index: {}]   ;;  %s4141_s11 = inlined_call_operand.vmem [shape: f32[32,128], index: 11, kind: input, shape index: {}]   ;;  %s4142_s14 = inlined_call_operand.vmem [shape: f32[2,8,32], index: 14, kind: output, shape index: {1}]   ;;  %s4143_s12 = inlined_call_operand.vmem [shape: f32[1,128], index: 12, kind: input, shape index: {}]   ;;  %s4144_s13 = inlined_call_operand.vmem [shape: f32[8,128], index: 13, kind: output, shape index: {0}]  }
   0x1   :  { %3430 = vset.pattern.permute.xlu1 %v3532_v0  ;;  %3429 = vset.pattern.permute.xlu0 %v3532_v0  ;;  %v48_v1 = vld [vmem:[%s4130_s0 + $0x10] sm:$0xff]  ;;  %v46_v2 = vld [vmem:[%s4130_s0] sm:$0xff]  ;;  %v49_v3 = vld [vmem:[%s4130_s0 + $0x18] sm:$0xff]  ;;  %v3533_v17 = vmov 0.0   ;;  %v3534_v35 = vmov 0.0|0.0   ;;  %vm3535_vm10 = vmmov 0  }
   0x2   :  { %63 = vperm.xlu1 %3430, %v48_v1   ;;  %57 = vperm.xlu0 %3429, %v46_v2   ;;  %v47_v4 = vld [vmem:[%s4130_s0 + $0x8] sm:$0xff]  ;;  %v104_v5 = vld [vmem:[%s4131_s1] sm:$0xff]  ;;  %v106_v8 = vld [vmem:[%s4131_s1 + $0x10] sm:$0xf]  ;;  %v55_v14 = vand.u32 127, %v54_v13  ;;  %vm289_vm11 = vcmask 130048  }
   0x3   :  { %v105_v6 = vld [vmem:[%s4131_s1 + $0x8] sm:$0xff]  ;;  %v50_v10 = vld [vmem:[%s4130_s0 + $0x20] sm:$0xff]  ;;  %v53_v11 = vld [vmem:[%s4130_s0 + $0x38] sm:$0xff]  ;;  %vm422_vm12 = vcmask 261120  }
   0x4   :  { %v3264_v7 = vpack.c.bf16 %v105_v6, %v104_v5  ;;  %v51_v9 = vld [vmem:[%s4130_s0 + $0x28] sm:$0xff]  ;;  %v52_v12 = vld [vmem:[%s4130_s0 + $0x30] sm:$0xff]  ;;  %v249_v32 = vld [vmem:[%s4132_s3] sm:$0xff] }
   0x5   :  { %v250_v33 = vld [vmem:[%s4132_s3 + $0x8] sm:$0xff]  ;;  %v2753_v36 = vld [vmem:[%s4133_s6] ss:$0 sm:$0xff]  ;;  %v257_v44 = vld [vmem:[%s4134_s4 + $0x10] sm:$0xff] }
   0x6   :  { %66 = vperm.xlu1 %3430, %v49_v3   ;;  %60 = vperm.xlu0 %3429, %v47_v4   ;;  %v3268_v34 = vpack.c.bf16 %v250_v33, %v249_v32  ;;  %v255_v37 = vld [vmem:[%s4134_s4] sm:$0xff]  ;;  %v256_v38 = vld [vmem:[%s4134_s4 + $0x8] sm:$0xff]  ;;  %v258_v45 = vld [vmem:[%s4134_s4 + $0x18] sm:$0xff] }
   0x7   :  { %3265 = vmatprep.subr.bf16.mxu0 %v3264_v7  ;;  %v3683_v42 = vpack.c.bf16 %v256_v38, %v255_v37  ;;  %v3694_v49 = vpack.c.bf16 %v258_v45, %v257_v44  ;;  %v419_v59 = vld [vmem:[%s4135_s2] sm:$0xff]  ;;  %v252_v33 = vld [vmem:[%s4138_s7 + $0x8] sm:$0xff]  ;;  %v254_v37 = vld [vmem:[%s4138_s7 + $0x18] sm:$0xff] }
   0x8   :  { %3267 = vmatpush3.bf16.msra.mxu0 %v3264_v7  ;;  %3269 = vmatprep.subr.bf16.mxu1 %v3268_v34  ;;  %v2756_v60 = vld [vmem:[%s4136_s5] ss:$0 sm:$0xff]  ;;  %s3537_s5 = smov 32  }
   0x9   :  { %2959 = vmatprep.subr.msk.mxu0 %vm132_vm0, %v106_v8  ;;  %3271 = vmatpush3.bf16.msra.mxu1 %v3268_v34  ;;  %v251_v32 = vld [vmem:[%s4138_s7] sm:$0xff] }
   0xa   :  { %72 = vperm.xlu1 %3430, %v51_v9   ;;  %69 = vperm.xlu0 %3429, %v50_v10   ;;  %v3756_v34 = vpack.c.bf16 %v252_v33, %v251_v32 }
   0xb   :  { %3272 = vmatprep.subr.bf16.mxu1 %v3534_v35 }
   0xc   :  { %2960 = vmatpush3.msk.msra.mxu0 %vm132_vm0, %v106_v8 }
   0xd   :  { %3278 = vmatprep.subr.bf16.mxu0 %v3534_v35 }
   0xe   :  { %78 = vperm.xlu1 %3430, %v53_v11   ;;  %75 = vperm.xlu0 %3429, %v52_v12  }
  0x12   :  { %503 = vrot.lane.b32.xlu0 %v2753_v36, %s3536_s23  ;;  %v253_v36 = vld [vmem:[%s4138_s7 + $0x10] sm:$0xff]  ;;  %s3538_s7 = smov 96  }
  0x81   :  { %v64_v15 = vpop.permute.xlu1 %63  ;;  %v58_v16 = vpop.permute.xlu0 %57 }
  0x82   :  { %vm80_vm2 = vcmp.eq.s32.totalorder %v58_v16, %v55_v14  ;;  %vm82_vm3 = vcmp.eq.s32.totalorder %v64_v15, %v55_v14 }
  0x83   :  { %v2736_v18 = vsel %vm80_vm2, 1.0, %v3533_v17  ;;  %v2738_v21 = vsel %vm82_vm3, 1.0, %v3533_v17 }
  0x84   :  { %2961 = vmatprep.mubr.msk.f32.mxu0 %vm107_vm1, %v2736_v18 }
  0x85   :  { %v67_v19 = vpop.permute.xlu1 %66  ;;  %v61_v20 = vpop.permute.xlu0 %60 }
  0x86   :  { %vm81_vm4 = vcmp.eq.s32.totalorder %v61_v20, %v55_v14  ;;  %vm83_vm5 = vcmp.eq.s32.totalorder %v67_v19, %v55_v14 }
  0x87   :  { %v2737_v22 = vsel %vm81_vm4, 1.0, %v3533_v17  ;;  %v2739_v25 = vsel %vm83_vm5, 1.0, %v3533_v17 }
  0x88   :  { %2962 = vmatmul.mubr.msk.f32.vlgmr.msra.gmra.mrb[0].mxu0 %vm107_vm1, %v2737_v22 }
  0x89   :  { %v73_v23 = vpop.permute.xlu1 %72  ;;  %2964 = vmatprep.mubr.msk.f32.mxu0 %vm107_vm1, %v2738_v21  ;;  %v70_v24 = vpop.permute.xlu0 %69  ;;  %3280 = vmatpush3.bf16.msra.mxu0 %v3756_v34 }
  0x8a   :  { %vm84_vm6 = vcmp.eq.s32.totalorder %v70_v24, %v55_v14  ;;  %vm85_vm7 = vcmp.eq.s32.totalorder %v73_v23, %v55_v14  ;;  %3281 = vmatprep.subr.bf16.mxu0 %v3534_v35 }
  0x8b   :  { %v2740_v26 = vsel %vm84_vm6, 1.0, %v3533_v17  ;;  %v2741_v29 = vsel %vm85_vm7, 1.0, %v3533_v17 }
  0x8c   :  { %2965 = vmatmul.mubr.msk.f32.gmra.mrb[2].mxu0 %vm107_vm1, %v2739_v25 }
  0x8d   :  { %v79_v27 = vpop.permute.xlu1 %78  ;;  %2967 = vmatprep.mubr.msk.f32.mxu0 %vm107_vm1, %v2740_v26  ;;  %v76_v28 = vpop.permute.xlu0 %75 }
  0x8e   :  { %vm86_vm8 = vcmp.eq.s32.totalorder %v76_v28, %v55_v14  ;;  %vm87_vm9 = vcmp.eq.s32.totalorder %v79_v27, %v55_v14  ;;  %v259_v27 = vld [vmem:[%s4137_s8] sm:$0xff]  ;;  %v260_v28 = vld [vmem:[%s4137_s8 + $0x8] sm:$0xff] }
  0x8f   :  { %v2742_v30 = vsel %vm86_vm8, 1.0, %v3533_v17  ;;  %v2743_v31 = vsel %vm87_vm9, 1.0, %v3533_v17 }
  0x90   :  { %2968 = vmatmul.mubr.msk.f32.gmra.mrb[4].mxu0 %vm107_vm1, %v2741_v29  ;;  %v261_v29 = vld [vmem:[%s4137_s8 + $0x10] sm:$0xff] }
  0x91   :  { %2970 = vmatprep.mubr.msk.f32.mxu0 %vm107_vm1, %v2742_v30  ;;  %v3730_v12 = vpop.permute.xlu0 %503  ;;  %v3745_v30 = vpack.c.bf16 %v260_v28, %v259_v27 }
  0x94   :  { %2971 = vmatmul.mubr.msk.f32.gmra.mrb[6].mxu0 %vm107_vm1, %v2743_v31  ;;  %v262_v31 = vld [vmem:[%s4137_s8 + $0x18] sm:$0xff] }
  0x95   :  { %3008 = vmatprep.mubr.msk.f32.mxu0 %vm3535_vm10, %v3533_v17  ;;  %v3765_v38 = vpack.c.bf16 %v262_v31, %v261_v29 }
 0x15b   :  { %v2963_v39 = vpop.f32.mrb[0].mxu0 }
 0x15c   :  { %v202_v40 = vpop.f32.mrb[1].mxu0  ;;  %v242_v43 = vmax.f32 %v2963_v39, 0.0  ;;  %v3769_v39 = vpack.c.bf16 %v254_v37, %v253_v36 }
 0x15d   :  { %v241_v41 = vmax.f32 %v202_v40, 0.0 }
 0x15e   :  { %3283 = vmatpush3.bf16.msra.mxu0 %v3769_v39 }
 0x15f   :  { %v2966_v46 = vpop.f32.mrb[2].mxu0  ;;  %2977 = vmatprep.mubr.msk.f32.mxu1 %vm289_vm11, %v241_v41  ;;  %v3776_v41 = vld [vmem:[%s4135_s2 + $0x8] sm:$0xff]  ;;  %3290 = vmatprep.subr.bf16.mxu0 %v3534_v35 }
 0x160   :  { %v212_v47 = vpop.f32.mrb[3].mxu0  ;;  %2978 = vmatmul.mubr.msk.f32.vlgmr.msra.gmra.mrb[0].mxu1 %vm289_vm11, %v242_v43  ;;  %v244_v50 = vmax.f32 %v2966_v46, 0.0 }
 0x161   :  { %v243_v48 = vmax.f32 %v212_v47, 0.0  ;;  %3274 = vmatpush3.bf16.msra.mxu1 %v3683_v42 }
 0x162   :  { %3275 = vmatprep.subr.bf16.mxu1 %v3534_v35 }
 0x163   :  { %v2969_v51 = vpop.f32.mrb[4].mxu0  ;;  %2980 = vmatprep.mubr.msk.f32.mxu1 %vm289_vm11, %v243_v48  ;;  %v2754_v48 = vld [vmem:[%s4139_s10] ss:$0 sm:$0xff] }
 0x164   :  { %v222_v52 = vpop.f32.mrb[5].mxu0  ;;  %2981 = vmatmul.mubr.msk.f32.gmra.mrb[2].mxu1 %vm289_vm11, %v244_v50  ;;  %v246_v54 = vmax.f32 %v2969_v51, 0.0 }
 0x165   :  { %v245_v53 = vmax.f32 %v222_v52, 0.0  ;;  %3277 = vmatpush3.bf16.msra.mxu1 %v3694_v49 }
 0x166   :  { %3284 = vmatprep.subr.bf16.mxu1 %v3534_v35 }
 0x167   :  { %v2972_v55 = vpop.f32.mrb[6].mxu0  ;;  %2983 = vmatprep.mubr.msk.f32.mxu1 %vm289_vm11, %v245_v53 }
 0x168   :  { %v232_v56 = vpop.f32.mrb[7].mxu0  ;;  %2984 = vmatmul.mubr.msk.f32.gmra.mrb[4].mxu1 %vm289_vm11, %v246_v54  ;;  %v248_v58 = vmax.f32 %v2972_v55, 0.0 }
 0x169   :  { %v247_v57 = vmax.f32 %v232_v56, 0.0  ;;  %v3816_v56 = vld [vmem:[%s4140_s9] ss:$0 sm:$0xff] }
 0x16b   :  { %2986 = vmatprep.mubr.msk.f32.mxu1 %vm289_vm11, %v247_v57 }
 0x16c   :  { %2987 = vmatmul.mubr.msk.f32.gmra.mrb[6].mxu1 %vm289_vm11, %v248_v58 }
 0x16d   :  { %2997 = vmatprep.mubr.msk.f32.mxu1 %vm3535_vm10, %v3533_v17 }
 0x170   :  { %2998 = vmatmul.mubr.msk.f32.vlgmr.msra.gmra.mrb[8].mxu1 %vm422_vm12, %v419_v59 }
 0x171   :  { %3019 = vmatprep.mubr.msk.f32.mxu1 %vm3535_vm10, %v3533_v17  ;;  %3286 = vmatpush3.bf16.msra.mxu1 %v3745_v30 }
 0x172   :  { %3287 = vmatprep.subr.bf16.mxu1 %v3534_v35 }
 0x175   :  { %3289 = vmatpush3.bf16.msra.mxu1 %v3765_v38 }
 0x176   :  { %3296 = vmatprep.subr.bf16.mxu1 %v3534_v35 }
 0x178   :  { %3020 = vmatmul.mubr.msk.f32.vlgmr.msra.gmra.mrb[10].mxu1 %vm422_vm12, %v3776_v41 }
 0x179   :  { %3298 = vmatpush3.bf16.msra.mxu1 %v3756_v34  ;;  %3041 = vmatprep.mubr.msk.f32.mxu1 %vm3535_vm10, %v3533_v17 }
 0x17a   :  { %3299 = vmatprep.subr.bf16.mxu1 %v3534_v35 }
 0x17d   :  { %3301 = vmatpush3.bf16.msra.mxu1 %v3769_v39 }
 0x17e   :  { %3308 = vmatprep.subr.bf16.mxu1 %v3534_v35 }
 0x233   :  { %v2979_v61 = vpop.f32.mrb[0].mxu1 }
 0x234   :  { %v3716_v62 = vadd.f32 %v2979_v61, %v2756_v60  ;;  %v380_v63 = vpop.f32.mrb[1].mxu1 }
 0x235   :  { %v381_v16 = vadd.f32 %v2756_v60, %v380_v63 }
 0x237   :  { %v2982_v0 = vpop.f32.mrb[2].mxu1 }
 0x238   :  { %v3718_v1 = vadd.f32 %v2982_v0, %v2756_v60  ;;  %v390_v2 = vpop.f32.mrb[3].mxu1 }
 0x239   :  { %v3720_v3 = vadd.f32 %v2756_v60, %v390_v2 }
 0x23b   :  { %v2985_v4 = vpop.f32.mrb[4].mxu1 }
 0x23c   :  { %v3722_v5 = vadd.f32 %v2985_v4, %v2756_v60  ;;  %v400_v6 = vpop.f32.mrb[5].mxu1 }
 0x23d   :  { %v3724_v7 = vadd.f32 %v2756_v60, %v400_v6 }
 0x23f   :  { %v2988_v8 = vpop.f32.mrb[6].mxu1 }
 0x240   :  { %v3726_v9 = vadd.f32 %v2988_v8, %v2756_v60  ;;  %v410_v10 = vpop.f32.mrb[7].mxu1 }
 0x241   :  { %v3728_v11 = vadd.f32 %v2756_v60, %v410_v10 }
 0x243   :  { %v492_v13 = vpop.f32.mrb[8].mxu1 }
 0x244   :  { %v2999_v14 = vpop.f32.mrb[9].mxu1  ;;  %v506_v15 = vadd.f32 %v3730_v12, %v492_v13  ;;  %v496_v18 = vadd.f32 %v492_v13, %v381_v16 }
 0x246   :  { %508 = vrot.lane.b32.xlu1 %v506_v15, %s3536_s23  ;;  %v2767_v19 = vmul.f32 -1.442695, %v496_v18 }
 0x248   :  { %3431 = vpow2.f32 %v2767_v19 }
 0x24b   :  { %v673_v51 = vpop.f32.mrb[10].mxu1 }
 0x24c   :  { %v3021_v52 = vpop.f32.mrb[11].mxu1 }
 0x252   :  { %v3432_v20 = vpop.eup %3431 }
 0x253   :  { %v500_v21 = vadd.f32 1.0, %v3432_v20 }
 0x255   :  { %3433 = vrcp.f32 %v500_v21 }
 0x25f   :  { %v3434_v22 = vpop.eup %3433 }
 0x260   :  { %v518_v44 = vsub.f32 1.0, %v3434_v22 }
 0x2b8   :  { %v509_v23 = vpop.permute.xlu1 %508 }
 0x2b9   :  { %v511_v24 = vmul.f32 %v3434_v22, %v509_v23 }
 0x2bb   :  { %513 = vrot.lane.b32.xlu0 %v511_v24, %s3536_s23 }
 0x2bf   :  { %524 = vrot.lane.b32.xlu0 %v419_v59, %s3537_s5 }
 0x2c3   :  { %684 = vrot.lane.b32.xlu0 %v2754_v48, %s3536_s23 }
 0x32d   :  { %v514_v25 = vpop.permute.xlu0 %513 }
 0x32e   :  { %v516_v26 = vadd.f32 %v514_v25, %v381_v16 }
 0x330   :  { %3435 = vtanh.f32 %v516_v26 }
 0x331   :  { %v525_v43 = vpop.permute.xlu0 %524 }
 0x332   :  { %v527_v46 = vmul.f32 %v3434_v22, %v525_v43 }
 0x335   :  { %v3795_v53 = vpop.permute.xlu0 %684 }
 0x336   :  { %v687_v54 = vadd.f32 %v3795_v53, %v673_v51 }
 0x338   :  { %689 = vrot.lane.b32.xlu0 %v687_v54, %s3536_s23 }
 0x33a   :  { %v3436_v40 = vpop.eup %3435 }
 0x33b   :  { %520 = vrot.lane.b32.xlu1 %v3436_v40, %s3538_s7 }
 0x3aa   :  { %v690_v8 = vpop.permute.xlu0 %689 }
 0x3ad   :  { %v521_v45 = vpop.permute.xlu1 %520 }
 0x3ae   :  { %v523_v47 = vmul.f32 %v521_v45, %v518_v44 }
 0x3b0   :  { %v528_v50 = vadd.f32 %v527_v46, %v523_v47 }
 0x3b2   :  { %530 = vrot.lane.b32.xlu1 %v528_v50, %s3538_s7 }
 0x424   :  { %v531_v55 = vpop.permute.xlu1 %530 }
 0x425   :  { %3009 = vmatmul.mubr.msk.f32.vlgmr.msra.gmra.mrb[8].mxu0 %vm422_vm12, %v531_v55 }
 0x426   :  { %3292 = vmatpush3.bf16.msra.mxu0 %v3683_v42  ;;  %3030 = vmatprep.mubr.msk.f32.mxu0 %vm3535_vm10, %v3533_v17 }
 0x427   :  { %3293 = vmatprep.subr.bf16.mxu0 %v3534_v35 }
 0x42a   :  { %3295 = vmatpush3.bf16.msra.mxu0 %v3694_v49 }
 0x42b   :  { %3302 = vmatprep.subr.bf16.mxu0 %v3534_v35 }
 0x42d   :  { %3031 = vmatmul.mubr.msk.f32.vlgmr.msra.gmra.mrb[10].mxu0 %vm422_vm12, %v531_v55 }
 0x42e   :  { %3304 = vmatpush3.bf16.msra.mxu0 %v3745_v30  ;;  %3052 = vmatprep.mubr.msk.f32.mxu0 %vm3535_vm10, %v3533_v17 }
 0x42f   :  { %3305 = vmatprep.subr.bf16.mxu0 %v3534_v35 }
 0x432   :  { %3307 = vmatpush3.bf16.msra.mxu0 %v3765_v38 }
 0x433   :  { %3314 = vmatprep.subr.bf16.mxu0 %v3534_v35 }
 0x4f8   :  { %v600_v57 = vpop.f32.mrb[8].mxu0 }
 0x4f9   :  { %v601_v58 = vadd.f32 %v3816_v56, %v600_v57  ;;  %v3010_v59 = vpop.f32.mrb[9].mxu0 }
 0x4fb   :  { %v677_v60 = vadd.f32 %v673_v51, %v601_v58 }
 0x4fd   :  { %v2770_v61 = vmul.f32 -1.442695, %v677_v60 }
 0x4ff   :  { %3437 = vpow2.f32 %v2770_v61 }
 0x500   :  { %v776_v63 = vpop.f32.mrb[10].mxu0 }
 0x501   :  { %v787_v0 = vadd.f32 %v776_v63, %v3730_v12  ;;  %v3032_v2 = vpop.f32.mrb[11].mxu0  ;;  %v780_v14 = vadd.f32 %v776_v63, %v3716_v62 }
 0x503   :  { %789 = vrot.lane.b32.xlu1 %v787_v0, %s3536_s23  ;;  %v2772_v15 = vmul.f32 -1.442695, %v780_v14 }
 0x509   :  { %v3438_v4 = vpop.eup %3437 }
 0x50a   :  { %v681_v6 = vadd.f32 1.0, %v3438_v4 }
 0x50c   :  { %3439 = vrcp.f32 %v681_v6 }
 0x50d   :  { %3441 = vpow2.f32 %v2772_v15 }
 0x516   :  { %v3440_v10 = vpop.eup %3439 }
 0x517   :  { %v692_v13 = vmul.f32 %v3440_v10, %v690_v8  ;;  %v3442_v16 = vpop.eup %3441  ;;  %v699_v36 = vsub.f32 1.0, %v3440_v10 }
 0x518   :  { %v784_v18 = vadd.f32 1.0, %v3442_v16 }
 0x519   :  { %694 = vrot.lane.b32.xlu0 %v692_v13, %s3536_s23 }
 0x51a   :  { %3443 = vrcp.f32 %v784_v18 }
 0x524   :  { %v3444_v19 = vpop.eup %3443 }
 0x525   :  { %v799_v28 = vsub.f32 1.0, %v3444_v19  ;;  %v805_v31 = vmul.f32 %v3444_v19, %v528_v50 }
 0x575   :  { %v790_v20 = vpop.permute.xlu1 %789 }
 0x576   :  { %v792_v21 = vmul.f32 %v3444_v19, %v790_v20 }
 0x578   :  { %794 = vrot.lane.b32.xlu1 %v792_v21, %s3536_s23 }
 0x58b   :  { %v695_v22 = vpop.permute.xlu0 %694 }
 0x58c   :  { %v697_v23 = vadd.f32 %v695_v22, %v601_v58 }
 0x58e   :  { %3445 = vtanh.f32 %v697_v23 }
 0x598   :  { %v3446_v24 = vpop.eup %3445 }
 0x599   :  { %701 = vrot.lane.b32.xlu0 %v3446_v24, %s3538_s7 }
 0x5ea   :  { %v795_v25 = vpop.permute.xlu1 %794 }
 0x5eb   :  { %v797_v26 = vadd.f32 %v795_v25, %v3716_v62 }
 0x5ed   :  { %3447 = vtanh.f32 %v797_v26 }
 0x5f7   :  { %v3448_v27 = vpop.eup %3447 }
 0x5f8   :  { %801 = vrot.lane.b32.xlu1 %v3448_v27, %s3538_s7 }
 0x5fc   :  { %705 = vrot.lane.b32.xlu1 %v3776_v41, %s3537_s5 }
 0x60b   :  { %v702_v33 = vpop.permute.xlu0 %701 }
 0x60c   :  { %v704_v43 = vmul.f32 %v702_v33, %v699_v36 }
 0x66a   :  { %v802_v29 = vpop.permute.xlu1 %801 }
 0x66b   :  { %v804_v32 = vmul.f32 %v802_v29, %v799_v28 }
 0x66d   :  { %v3829_v37 = vadd.f32 %v805_v31, %v804_v32 }
 0x66e   :  { %v706_v40 = vpop.permute.xlu1 %705 }
 0x66f   :  { %v708_v44 = vmul.f32 %v3440_v10, %v706_v40  ;;  %808 = vrot.lane.b32.xlu0 %v3829_v37, %s3538_s7 }
 0x671   :  { %v3833_v62 = vadd.f32 %v708_v44, %v704_v43 }
 0x673   :  { %883 = vrot.lane.b32.xlu1 %v3833_v62, %s3538_s7 }
 0x6e1   :  { %v809_v41 = vpop.permute.xlu0 %808 }
 0x6e2   :  { %3042 = vmatmul.mubr.msk.f32.vlgmr.msra.gmra.mrb[12].mxu1 %vm422_vm12, %v809_v41 }
 0x6e3   :  { %3310 = vmatpush3.bf16.msra.mxu1 %v3683_v42  ;;  %3063 = vmatprep.mubr.msk.f32.mxu1 %vm3535_vm10, %v3533_v17 }
 0x6e4   :  { %3311 = vmatprep.subr.bf16.mxu1 %v3534_v35 }
 0x6e5   :  { %v3842_v45 = vpop.permute.xlu1 %883 }
 0x6e6   :  { %3053 = vmatmul.mubr.msk.f32.vlgmr.msra.gmra.mrb[12].mxu0 %vm422_vm12, %v3842_v45 }
 0x6e7   :  { %3313 = vmatpush3.bf16.msra.mxu1 %v3694_v49  ;;  %3316 = vmatpush3.bf16.msra.mxu0 %v3756_v34 }
 0x6e8   :  { %3320 = vmatprep.subr.bf16.mxu1 %v3534_v35  ;;  %3317 = vmatprep.subr.bf16.mxu0 %v3534_v35 }
 0x6e9   :  { %3074 = vmatprep.mubr.msk.f32.mxu0 %vm3535_vm10, %v3533_v17 }
 0x6ea   :  { %3064 = vmatmul.mubr.msk.f32.vlgmr.msra.gmra.mrb[14].mxu1 %vm422_vm12, %v809_v41 }
 0x6eb   :  { %3322 = vmatpush3.bf16.msra.mxu1 %v3745_v30  ;;  %3319 = vmatpush3.bf16.msra.mxu0 %v3769_v39 }
 0x6ec   :  { %3323 = vmatprep.subr.bf16.mxu1 %v3534_v35  ;;  %3085 = vmatprep.mubr.msk.f32.mxu1 %vm3535_vm10, %v3533_v17 }
 0x6ed   :  { %3326 = vmatprep.subr.bf16.mxu0 %v3534_v35 }
 0x6ef   :  { %3325 = vmatpush3.bf16.msra.mxu1 %v3765_v38 }
 0x6f0   :  { %3332 = vmatprep.subr.bf16.mxu1 %v3534_v35 }
 0x7b5   :  { %v878_v46 = vpop.f32.mrb[12].mxu1 }
 0x7b6   :  { %v3043_v47 = vpop.f32.mrb[13].mxu1  ;;  %v879_v57 = vadd.f32 %v3816_v56, %v878_v46 }
 0x7b9   :  { %v953_v48 = vpop.f32.mrb[12].mxu0 }
 0x7ba   :  { %v964_v50 = vadd.f32 %v953_v48, %v3795_v53  ;;  %v3054_v51 = vpop.f32.mrb[13].mxu0  ;;  %v957_v58 = vadd.f32 %v953_v48, %v879_v57 }
 0x7bc   :  { %966 = vrot.lane.b32.xlu1 %v964_v50, %s3536_s23  ;;  %v2775_v59 = vmul.f32 -1.442695, %v957_v58 }
 0x7bd   :  { %v1050_v52 = vpop.f32.mrb[14].mxu1 }
 0x7be   :  { %v1061_v54 = vadd.f32 %v1050_v52, %v3730_v12  ;;  %v3065_v55 = vpop.f32.mrb[15].mxu1  ;;  %v1054_v60 = vadd.f32 %v1050_v52, %v3720_v3  ;;  %3449 = vpow2.f32 %v2775_v59 }
 0x7c0   :  { %1063 = vrot.lane.b32.xlu0 %v1061_v54, %s3536_s23  ;;  %v2777_v61 = vmul.f32 -1.442695, %v1054_v60 }
 0x7c2   :  { %3451 = vpow2.f32 %v2777_v61 }
 0x7c8   :  { %v3450_v63 = vpop.eup %3449 }
 0x7c9   :  { %v961_v0 = vadd.f32 1.0, %v3450_v63 }
 0x7cb   :  { %3453 = vrcp.f32 %v961_v0 }
 0x7cc   :  { %v3452_v2 = vpop.eup %3451 }
 0x7cd   :  { %v1058_v4 = vadd.f32 1.0, %v3452_v2 }
 0x7cf   :  { %3455 = vrcp.f32 %v1058_v4 }
 0x7d5   :  { %v3454_v6 = vpop.eup %3453 }
 0x7d6   :  { %v976_v23 = vsub.f32 1.0, %v3454_v6  ;;  %v982_v25 = vmul.f32 %v3454_v6, %v3833_v62 }
 0x7d9   :  { %v3456_v13 = vpop.eup %3455 }
 0x7da   :  { %v1073_v28 = vsub.f32 1.0, %v3456_v13  ;;  %v1079_v31 = vmul.f32 %v3456_v13, %v3829_v37 }
 0x82e   :  { %v967_v8 = vpop.permute.xlu1 %966 }
 0x82f   :  { %v969_v10 = vmul.f32 %v3454_v6, %v967_v8 }
 0x831   :  { %971 = vrot.lane.b32.xlu1 %v969_v10, %s3536_s23 }
 0x832   :  { %v1064_v14 = vpop.permute.xlu0 %1063 }
 0x833   :  { %v1066_v15 = vmul.f32 %v3456_v13, %v1064_v14 }
 0x835   :  { %1068 = vrot.lane.b32.xlu0 %v1066_v15, %s3536_s23 }
 0x8a3   :  { %v972_v16 = vpop.permute.xlu1 %971 }
 0x8a4   :  { %v974_v18 = vadd.f32 %v972_v16, %v879_v57 }
 0x8a6   :  { %3457 = vtanh.f32 %v974_v18 }
 0x8a7   :  { %v1069_v19 = vpop.permute.xlu0 %1068 }
 0x8a8   :  { %v1071_v20 = vadd.f32 %v1069_v19, %v3720_v3 }
 0x8aa   :  { %3459 = vtanh.f32 %v1071_v20 }
 0x8b0   :  { %v3458_v21 = vpop.eup %3457 }
 0x8b1   :  { %978 = vrot.lane.b32.xlu1 %v3458_v21, %s3538_s7 }
 0x8b4   :  { %v3460_v22 = vpop.eup %3459 }
 0x8b5   :  { %1075 = vrot.lane.b32.xlu0 %v3460_v22, %s3538_s7 }
 0x923   :  { %v979_v24 = vpop.permute.xlu1 %978 }
 0x924   :  { %v981_v26 = vmul.f32 %v979_v24, %v976_v23 }
 0x926   :  { %v3873_v27 = vadd.f32 %v982_v25, %v981_v26 }
 0x927   :  { %v1076_v29 = vpop.permute.xlu0 %1075 }
 0x928   :  { %v1078_v32 = vmul.f32 %v1076_v29, %v1073_v28  ;;  %1157 = vrot.lane.b32.xlu1 %v3873_v27, %s3538_s7 }
 0x92a   :  { %v3878_v3 = vadd.f32 %v1079_v31, %v1078_v32 }
 0x92c   :  { %1082 = vrot.lane.b32.xlu0 %v3878_v3, %s3538_s7 }
 0x99a   :  { %v1158_v33 = vpop.permute.xlu1 %1157 }
 0x99b   :  { %3086 = vmatmul.mubr.msk.f32.vlgmr.msra.gmra.mrb[16].mxu1 %vm422_vm12, %v1158_v33 }
 0x99c   :  { %3334 = vmatpush3.bf16.msra.mxu1 %v3756_v34  ;;  %3107 = vmatprep.mubr.msk.f32.mxu1 %vm3535_vm10, %v3533_v17 }
 0x99d   :  { %3335 = vmatprep.subr.bf16.mxu1 %v3534_v35 }
 0x99e   :  { %v1083_v36 = vpop.permute.xlu0 %1082 }
 0x99f   :  { %3075 = vmatmul.mubr.msk.f32.vlgmr.msra.gmra.mrb[14].mxu0 %vm422_vm12, %v1083_v36 }
 0x9a0   :  { %3328 = vmatpush3.bf16.msra.mxu0 %v3683_v42  ;;  %3096 = vmatprep.mubr.msk.f32.mxu0 %vm3535_vm10, %v3533_v17 }
 0x9a1   :  { %3329 = vmatprep.subr.bf16.mxu0 %v3534_v35  ;;  %3337 = vmatpush3.bf16.msra.mxu1 %v3769_v39 }
 0x9a2   :  { %3344 = vmatprep.subr.bf16.mxu1 %v3534_v35 }
 0x9a4   :  { %3331 = vmatpush3.bf16.msra.mxu0 %v3694_v49 }
 0x9a5   :  { %3338 = vmatprep.subr.bf16.mxu0 %v3534_v35 }
 0x9a7   :  { %3097 = vmatmul.mubr.msk.f32.vlgmr.msra.gmra.mrb[16].mxu0 %vm422_vm12, %v1083_v36 }
 0x9a8   :  { %3340 = vmatpush3.bf16.msra.mxu0 %v3745_v30  ;;  %3118 = vmatprep.mubr.msk.f32.mxu0 %vm3535_vm10, %v3533_v17 }
 0x9a9   :  { %3341 = vmatprep.subr.bf16.mxu0 %v3534_v35 }
 0x9ac   :  { %3343 = vmatpush3.bf16.msra.mxu0 %v3765_v38 }
 0x9ad   :  { %3350 = vmatprep.subr.bf16.mxu0 %v3534_v35 }
 0xa6e   :  { %v1227_v37 = vpop.f32.mrb[16].mxu1 }
 0xa6f   :  { %v1238_v40 = vadd.f32 %v1227_v37, %v3795_v53  ;;  %v3087_v43 = vpop.f32.mrb[17].mxu1 }
 0xa71   :  { %1240 = vrot.lane.b32.xlu0 %v1238_v40, %s3536_s23 }
 0xa72   :  { %v1152_v44 = vpop.f32.mrb[14].mxu0 }
 0xa73   :  { %v3076_v62 = vpop.f32.mrb[15].mxu0  ;;  %v1153_v48 = vadd.f32 %v3816_v56, %v1152_v44 }
 0xa75   :  { %v1231_v50 = vadd.f32 %v1227_v37, %v1153_v48 }
 0xa77   :  { %v2780_v51 = vmul.f32 -1.442695, %v1231_v50 }
 0xa79   :  { %3461 = vpow2.f32 %v2780_v51 }
 0xa7a   :  { %v1324_v41 = vpop.f32.mrb[16].mxu0 }
 0xa7b   :  { %v1335_v46 = vadd.f32 %v1324_v41, %v3730_v12  ;;  %v3098_v47 = vpop.f32.mrb[17].mxu0  ;;  %v1328_v52 = vadd.f32 %v1324_v41, %v3718_v1 }
 0xa7d   :  { %1337 = vrot.lane.b32.xlu1 %v1335_v46, %s3536_s23  ;;  %v2782_v54 = vmul.f32 -1.442695, %v1328_v52 }
 0xa7f   :  { %3463 = vpow2.f32 %v2782_v54 }
 0xa83   :  { %v3462_v55 = vpop.eup %3461 }
 0xa84   :  { %v1235_v57 = vadd.f32 1.0, %v3462_v55 }
 0xa86   :  { %3465 = vrcp.f32 %v1235_v57 }
 0xa89   :  { %v3464_v58 = vpop.eup %3463 }
 0xa8a   :  { %v1332_v59 = vadd.f32 1.0, %v3464_v58 }
 0xa8c   :  { %3467 = vrcp.f32 %v1332_v59 }
 0xa90   :  { %v3466_v60 = vpop.eup %3465 }
 0xa91   :  { %v1250_v16 = vsub.f32 1.0, %v3466_v60  ;;  %v1256_v19 = vmul.f32 %v3466_v60, %v3873_v27 }
 0xa96   :  { %v3468_v0 = vpop.eup %3467 }
 0xa97   :  { %v1347_v22 = vsub.f32 1.0, %v3468_v0 }
 0xae3   :  { %v1241_v61 = vpop.permute.xlu0 %1240 }
 0xae4   :  { %v1243_v63 = vmul.f32 %v3466_v60, %v1241_v61 }
 0xae6   :  { %1245 = vrot.lane.b32.xlu0 %v1243_v63, %s3536_s23 }
 0xaef   :  { %v1338_v2 = vpop.permute.xlu1 %1337 }
 0xaf0   :  { %v1340_v4 = vmul.f32 %v3468_v0, %v1338_v2 }
 0xaf2   :  { %1342 = vrot.lane.b32.xlu1 %v1340_v4, %s3536_s23 }
 0xb58   :  { %v1246_v6 = vpop.permute.xlu0 %1245 }
 0xb59   :  { %v1248_v8 = vadd.f32 %v1246_v6, %v1153_v48 }
 0xb5b   :  { %3469 = vtanh.f32 %v1248_v8 }
 0xb64   :  { %v1343_v10 = vpop.permute.xlu1 %1342 }
 0xb65   :  { %v3470_v13 = vpop.eup %3469  ;;  %v1345_v14 = vadd.f32 %v1343_v10, %v3718_v1  ;;  %v1353_v1 = vmul.f32 %v3468_v0, %v3878_v3 }
 0xb66   :  { %1252 = vrot.lane.b32.xlu0 %v3470_v13, %s3538_s7 }
 0xb67   :  { %3471 = vtanh.f32 %v1345_v14 }
 0xb71   :  { %v3472_v15 = vpop.eup %3471 }
 0xb72   :  { %1349 = vrot.lane.b32.xlu1 %v3472_v15, %s3538_s7 }
 0xbd8   :  { %v1253_v18 = vpop.permute.xlu0 %1252 }
 0xbd9   :  { %v1255_v20 = vmul.f32 %v1253_v18, %v1250_v16 }
 0xbdb   :  { %v3915_v21 = vadd.f32 %v1256_v19, %v1255_v20 }
 0xbdd   :  { %1431 = vrot.lane.b32.xlu0 %v3915_v21, %s3538_s7 }
 0xbe4   :  { %v1350_v23 = vpop.permute.xlu1 %1349 }
 0xbe5   :  { %v1352_v24 = vmul.f32 %v1350_v23, %v1347_v22 }
 0xbe7   :  { %v3920_v25 = vadd.f32 %v1353_v1, %v1352_v24 }
 0xbe9   :  { %1356 = vrot.lane.b32.xlu1 %v3920_v25, %s3538_s7 }
 0xc4f   :  { %v1432_v26 = vpop.permute.xlu0 %1431 }
 0xc50   :  { %3119 = vmatmul.mubr.msk.f32.vlgmr.msra.gmra.mrb[18].mxu0 %vm422_vm12, %v1432_v26 }
 0xc51   :  { %3352 = vmatpush3.bf16.msra.mxu0 %v3756_v34  ;;  %3140 = vmatprep.mubr.msk.f32.mxu0 %vm3535_vm10, %v3533_v17 }
 0xc52   :  { %3353 = vmatprep.subr.bf16.mxu0 %v3534_v35 }
 0xc55   :  { %3355 = vmatpush3.bf16.msra.mxu0 %v3769_v39 }
 0xc56   :  { %3362 = vmatprep.subr.bf16.mxu0 %v3534_v35 }
 0xc5b   :  { %v1357_v27 = vpop.permute.xlu1 %1356 }
 0xc5c   :  { %3108 = vmatmul.mubr.msk.f32.vlgmr.msra.gmra.mrb[18].mxu1 %vm422_vm12, %v1357_v27 }
 0xc5d   :  { %3346 = vmatpush3.bf16.msra.mxu1 %v3683_v42  ;;  %3129 = vmatprep.mubr.msk.f32.mxu1 %vm3535_vm10, %v3533_v17 }
 0xc5e   :  { %3347 = vmatprep.subr.bf16.mxu1 %v3534_v35 }
 0xc61   :  { %3349 = vmatpush3.bf16.msra.mxu1 %v3694_v49 }
 0xc62   :  { %3356 = vmatprep.subr.bf16.mxu1 %v3534_v35 }
 0xc64   :  { %3130 = vmatmul.mubr.msk.f32.vlgmr.msra.gmra.mrb[20].mxu1 %vm422_vm12, %v1357_v27 }
 0xc65   :  { %3358 = vmatpush3.bf16.msra.mxu1 %v3745_v30  ;;  %3151 = vmatprep.mubr.msk.f32.mxu1 %vm3535_vm10, %v3533_v17 }
 0xc66   :  { %3359 = vmatprep.subr.bf16.mxu1 %v3534_v35 }
 0xc69   :  { %3361 = vmatpush3.bf16.msra.mxu1 %v3765_v38 }
 0xc6a   :  { %3368 = vmatprep.subr.bf16.mxu1 %v3534_v35 }
 0xd23   :  { %v1501_v28 = vpop.f32.mrb[18].mxu0 }
 0xd24   :  { %v1512_v29 = vadd.f32 %v1501_v28, %v3795_v53  ;;  %v3120_v31 = vpop.f32.mrb[19].mxu0 }
 0xd26   :  { %1514 = vrot.lane.b32.xlu0 %v1512_v29, %s3536_s23 }
 0xd2f   :  { %v1426_v32 = vpop.f32.mrb[18].mxu1 }
 0xd30   :  { %v3109_v3 = vpop.f32.mrb[19].mxu1  ;;  %v1427_v40 = vadd.f32 %v3816_v56, %v1426_v32 }
 0xd32   :  { %v1505_v43 = vadd.f32 %v1501_v28, %v1427_v40 }
 0xd34   :  { %v2785_v44 = vmul.f32 -1.442695, %v1505_v43 }
 0xd36   :  { %3473 = vpow2.f32 %v2785_v44 }
 0xd37   :  { %v1598_v33 = vpop.f32.mrb[20].mxu1 }
 0xd38   :  { %v1609_v36 = vadd.f32 %v1598_v33, %v3730_v12  ;;  %v3131_v37 = vpop.f32.mrb[21].mxu1  ;;  %v1602_v41 = vadd.f32 %v1598_v33, %v3724_v7 }
 0xd3a   :  { %1611 = vrot.lane.b32.xlu1 %v1609_v36, %s3536_s23  ;;  %v2787_v47 = vmul.f32 -1.442695, %v1602_v41 }
 0xd40   :  { %v3474_v62 = vpop.eup %3473 }
 0xd41   :  { %v1509_v46 = vadd.f32 1.0, %v3474_v62 }
 0xd43   :  { %3475 = vrcp.f32 %v1509_v46 }
 0xd44   :  { %3477 = vpow2.f32 %v2787_v47 }
 0xd4d   :  { %v3476_v48 = vpop.eup %3475 }
 0xd4e   :  { %v3478_v52 = vpop.eup %3477  ;;  %v1524_v4 = vsub.f32 1.0, %v3476_v48  ;;  %v1530_v8 = vmul.f32 %v3476_v48, %v3915_v21 }
 0xd4f   :  { %v1606_v54 = vadd.f32 1.0, %v3478_v52 }
 0xd51   :  { %3479 = vrcp.f32 %v1606_v54 }
 0xd5b   :  { %v3480_v55 = vpop.eup %3479 }
 0xd5c   :  { %v1621_v14 = vsub.f32 1.0, %v3480_v55  ;;  %v1627_v16 = vmul.f32 %v3480_v55, %v3920_v25 }
 0xd98   :  { %v1515_v50 = vpop.permute.xlu0 %1514 }
 0xd99   :  { %v1517_v51 = vmul.f32 %v3476_v48, %v1515_v50 }
 0xd9b   :  { %1519 = vrot.lane.b32.xlu0 %v1517_v51, %s3536_s23 }
 0xdac   :  { %v1612_v57 = vpop.permute.xlu1 %1611 }
 0xdad   :  { %v1614_v58 = vmul.f32 %v3480_v55, %v1612_v57 }
 0xdaf   :  { %1616 = vrot.lane.b32.xlu1 %v1614_v58, %s3536_s23 }
 0xe0d   :  { %v1520_v59 = vpop.permute.xlu0 %1519 }
 0xe0e   :  { %v1522_v60 = vadd.f32 %v1520_v59, %v1427_v40 }
 0xe10   :  { %3481 = vtanh.f32 %v1522_v60 }
 0xe1a   :  { %v3482_v61 = vpop.eup %3481 }
 0xe1b   :  { %1526 = vrot.lane.b32.xlu0 %v3482_v61, %s3538_s7 }
 0xe21   :  { %v1617_v63 = vpop.permute.xlu1 %1616 }
 0xe22   :  { %v1619_v0 = vadd.f32 %v1617_v63, %v3724_v7 }
 0xe24   :  { %3483 = vtanh.f32 %v1619_v0 }
 0xe2e   :  { %v3484_v2 = vpop.eup %3483 }
 0xe2f   :  { %1623 = vrot.lane.b32.xlu1 %v3484_v2, %s3538_s7 }
 0xe8d   :  { %v1527_v6 = vpop.permute.xlu0 %1526 }
 0xe8e   :  { %v1529_v10 = vmul.f32 %v1527_v6, %v1524_v4 }
 0xe90   :  { %v3957_v13 = vadd.f32 %v1530_v8, %v1529_v10 }
 0xe92   :  { %1705 = vrot.lane.b32.xlu0 %v3957_v13, %s3538_s7 }
 0xea1   :  { %v1624_v15 = vpop.permute.xlu1 %1623 }
 0xea2   :  { %v1626_v18 = vmul.f32 %v1624_v15, %v1621_v14 }
 0xea4   :  { %v3962_v7 = vadd.f32 %v1627_v16, %v1626_v18 }
 0xea6   :  { %1630 = vrot.lane.b32.xlu1 %v3962_v7, %s3538_s7 }
 0xf04   :  { %v1706_v19 = vpop.permute.xlu0 %1705 }
 0xf05   :  { %3152 = vmatmul.mubr.msk.f32.vlgmr.msra.gmra.mrb[22].mxu1 %vm422_vm12, %v1706_v19 }
 0xf06   :  { %3370 = vmatpush3.bf16.msra.mxu1 %v3756_v34  ;;  %3173 = vmatprep.mubr.msk.f32.mxu1 %vm3535_vm10, %v3533_v17 }
 0xf07   :  { %3371 = vmatprep.subr.bf16.mxu1 %v3534_v35 }
 0xf0a   :  { %3373 = vmatpush3.bf16.msra.mxu1 %v3769_v39 }
 0xf0b   :  { %3380 = vmatprep.subr.bf16.mxu1 %v3534_v35 }
 0xf18   :  { %v1631_v20 = vpop.permute.xlu1 %1630 }
 0xf19   :  { %3141 = vmatmul.mubr.msk.f32.vlgmr.msra.gmra.mrb[20].mxu0 %vm422_vm12, %v1631_v20 }
 0xf1a   :  { %3364 = vmatpush3.bf16.msra.mxu0 %v3683_v42  ;;  %3162 = vmatprep.mubr.msk.f32.mxu0 %vm3535_vm10, %v3533_v17 }
 0xf1b   :  { %3365 = vmatprep.subr.bf16.mxu0 %v3534_v35 }
 0xf1e   :  { %3367 = vmatpush3.bf16.msra.mxu0 %v3694_v49 }
 0xf1f   :  { %3374 = vmatprep.subr.bf16.mxu0 %v3534_v35 }
 0xf21   :  { %3163 = vmatmul.mubr.msk.f32.vlgmr.msra.gmra.mrb[22].mxu0 %vm422_vm12, %v1631_v20 }
 0xf22   :  { %3376 = vmatpush3.bf16.msra.mxu0 %v3745_v30  ;;  %3184 = vmatprep.mubr.msk.f32.mxu0 %vm3535_vm10, %v3533_v17 }
 0xf23   :  { %3377 = vmatprep.subr.bf16.mxu0 %v3534_v35 }
 0xf26   :  { %3379 = vmatpush3.bf16.msra.mxu0 %v3765_v38 }
 0xf27   :  { %3386 = vmatprep.subr.bf16.mxu0 %v3534_v35 }
 0xfd8   :  { %v1775_v21 = vpop.f32.mrb[22].mxu1 }
 0xfd9   :  { %v1786_v22 = vadd.f32 %v1775_v21, %v3795_v53  ;;  %v3153_v23 = vpop.f32.mrb[23].mxu1 }
 0xfdb   :  { %1788 = vrot.lane.b32.xlu0 %v1786_v22, %s3536_s23 }
 0xfec   :  { %v1700_v1 = vpop.f32.mrb[20].mxu0 }
 0xfed   :  { %v3142_v24 = vpop.f32.mrb[21].mxu0  ;;  %v1701_v28 = vadd.f32 %v3816_v56, %v1700_v1 }
 0xfef   :  { %v1779_v29 = vadd.f32 %v1775_v21, %v1701_v28 }
 0xff1   :  { %v2790_v31 = vmul.f32 -1.442695, %v1779_v29 }
 0xff3   :  { %3485 = vpow2.f32 %v2790_v31 }
 0xff4   :  { %v1872_v25 = vpop.f32.mrb[22].mxu0 }
 0xff5   :  { %v1883_v26 = vadd.f32 %v1872_v25, %v3730_v12  ;;  %v3164_v27 = vpop.f32.mrb[23].mxu0  ;;  %v1876_v33 = vadd.f32 %v1872_v25, %v3722_v5 }
 0xff7   :  { %1885 = vrot.lane.b32.xlu1 %v1883_v26, %s3536_s23  ;;  %v2792_v36 = vmul.f32 -1.442695, %v1876_v33 }
 0xffd   :  { %v3486_v32 = vpop.eup %3485 }
 0xffe   :  { %v1783_v3 = vadd.f32 1.0, %v3486_v32 }
0x1000   :  { %3487 = vrcp.f32 %v1783_v3 }
0x1001   :  { %3489 = vpow2.f32 %v2792_v36 }
0x100a   :  { %v3488_v37 = vpop.eup %3487 }
0x100b   :  { %v3490_v44 = vpop.eup %3489  ;;  %v1798_v57 = vsub.f32 1.0, %v3488_v37  ;;  %v1804_v59 = vmul.f32 %v3488_v37, %v3957_v13 }
0x100c   :  { %v1880_v62 = vadd.f32 1.0, %v3490_v44 }
0x100e   :  { %3491 = vrcp.f32 %v1880_v62 }
0x1018   :  { %v3492_v41 = vpop.eup %3491 }
0x1019   :  { %v1895_v63 = vsub.f32 1.0, %v3492_v41  ;;  %v1901_v2 = vmul.f32 %v3492_v41, %v3962_v7 }
0x104d   :  { %v1789_v40 = vpop.permute.xlu0 %1788 }
0x104e   :  { %v1791_v43 = vmul.f32 %v3488_v37, %v1789_v40 }
0x1050   :  { %1793 = vrot.lane.b32.xlu0 %v1791_v43, %s3536_s23 }
0x1069   :  { %v1886_v46 = vpop.permute.xlu1 %1885 }
0x106a   :  { %v1888_v47 = vmul.f32 %v3492_v41, %v1886_v46 }
0x106c   :  { %1890 = vrot.lane.b32.xlu1 %v1888_v47, %s3536_s23 }
0x10c2   :  { %v1794_v48 = vpop.permute.xlu0 %1793 }
0x10c3   :  { %v1796_v50 = vadd.f32 %v1794_v48, %v1701_v28 }
0x10c5   :  { %3493 = vtanh.f32 %v1796_v50 }
0x10cf   :  { %v3494_v51 = vpop.eup %3493 }
0x10d0   :  { %1800 = vrot.lane.b32.xlu0 %v3494_v51, %s3538_s7 }
0x10de   :  { %v1891_v52 = vpop.permute.xlu1 %1890 }
0x10df   :  { %v1893_v54 = vadd.f32 %v1891_v52, %v3722_v5 }
0x10e1   :  { %3495 = vtanh.f32 %v1893_v54 }
0x10eb   :  { %v3496_v55 = vpop.eup %3495 }
0x10ec   :  { %1897 = vrot.lane.b32.xlu1 %v3496_v55, %s3538_s7 }
0x1142   :  { %v1801_v58 = vpop.permute.xlu0 %1800 }
0x1143   :  { %v1803_v60 = vmul.f32 %v1801_v58, %v1798_v57 }
0x1145   :  { %v3999_v61 = vadd.f32 %v1804_v59, %v1803_v60 }
0x1147   :  { %1979 = vrot.lane.b32.xlu0 %v3999_v61, %s3538_s7 }
0x115e   :  { %v1898_v0 = vpop.permute.xlu1 %1897 }
0x115f   :  { %v1900_v4 = vmul.f32 %v1898_v0, %v1895_v63 }
0x1161   :  { %v4004_v5 = vadd.f32 %v1901_v2, %v1900_v4 }
0x1163   :  { %1904 = vrot.lane.b32.xlu1 %v4004_v5, %s3538_s7 }
0x11b9   :  { %v1980_v6 = vpop.permute.xlu0 %1979 }
0x11ba   :  { %3185 = vmatmul.mubr.msk.f32.vlgmr.msra.gmra.mrb[24].mxu0 %vm422_vm12, %v1980_v6 }
0x11bb   :  { %3388 = vmatpush3.bf16.msra.mxu0 %v3756_v34  ;;  %3206 = vmatprep.mubr.msk.f32.mxu0 %vm3535_vm10, %v3533_v17 }
0x11bc   :  { %3389 = vmatprep.subr.bf16.mxu0 %v3534_v35 }
0x11bf   :  { %3391 = vmatpush3.bf16.msra.mxu0 %v3769_v39 }
0x11c0   :  { %3398 = vmatprep.subr.bf16.mxu0 %v3534_v35 }
0x11d5   :  { %v1905_v8 = vpop.permute.xlu1 %1904 }
0x11d6   :  { %3174 = vmatmul.mubr.msk.f32.vlgmr.msra.gmra.mrb[24].mxu1 %vm422_vm12, %v1905_v8 }
0x11d7   :  { %3382 = vmatpush3.bf16.msra.mxu1 %v3683_v42  ;;  %3195 = vmatprep.mubr.msk.f32.mxu1 %vm3535_vm10, %v3533_v17 }
0x11d8   :  { %3383 = vmatprep.subr.bf16.mxu1 %v3534_v35 }
0x11db   :  { %3385 = vmatpush3.bf16.msra.mxu1 %v3694_v49 }
0x11dc   :  { %3392 = vmatprep.subr.bf16.mxu1 %v3534_v35 }
0x11de   :  { %3196 = vmatmul.mubr.msk.f32.vlgmr.msra.gmra.mrb[26].mxu1 %vm422_vm12, %v1905_v8 }
0x11df   :  { %3394 = vmatpush3.bf16.msra.mxu1 %v3745_v30  ;;  %3217 = vmatprep.mubr.msk.f32.mxu1 %vm3535_vm10, %v3533_v17 }
0x11e0   :  { %3395 = vmatprep.subr.bf16.mxu1 %v3534_v35 }
0x11e3   :  { %3397 = vmatpush3.bf16.msra.mxu1 %v3765_v38 }
0x11e4   :  { %3404 = vmatprep.subr.bf16.mxu1 %v3534_v35 }
0x128d   :  { %v2049_v10 = vpop.f32.mrb[24].mxu0 }
0x128e   :  { %v2060_v13 = vadd.f32 %v2049_v10, %v3795_v53  ;;  %v3186_v14 = vpop.f32.mrb[25].mxu0 }
0x1290   :  { %2062 = vrot.lane.b32.xlu0 %v2060_v13, %s3536_s23 }
0x12a9   :  { %v1974_v15 = vpop.f32.mrb[24].mxu1 }
0x12aa   :  { %v3175_v16 = vpop.f32.mrb[25].mxu1  ;;  %v1975_v20 = vadd.f32 %v3816_v56, %v1974_v15 }
0x12ac   :  { %v2053_v21 = vadd.f32 %v2049_v10, %v1975_v20 }
0x12ae   :  { %v2795_v22 = vmul.f32 -1.442695, %v2053_v21 }
0x12b0   :  { %3497 = vpow2.f32 %v2795_v22 }
0x12b1   :  { %v2146_v18 = vpop.f32.mrb[26].mxu1 }
0x12b2   :  { %v2157_v7 = vadd.f32 %v2146_v18, %v3730_v12  ;;  %v3197_v19 = vpop.f32.mrb[27].mxu1  ;;  %v2150_v26 = vadd.f32 %v2146_v18, %v3728_v11 }
0x12b4   :  { %2159 = vrot.lane.b32.xlu1 %v2157_v7, %s3536_s23  ;;  %v2797_v28 = vmul.f32 -1.442695, %v2150_v26 }
0x12ba   :  { %v3498_v23 = vpop.eup %3497 }
0x12bb   :  { %v2057_v1 = vadd.f32 1.0, %v3498_v23 }
0x12bd   :  { %3499 = vrcp.f32 %v2057_v1 }
0x12be   :  { %3501 = vpow2.f32 %v2797_v28 }
0x12c7   :  { %v3500_v24 = vpop.eup %3499 }
0x12c8   :  { %v3502_v29 = vpop.eup %3501  ;;  %v2072_v41 = vsub.f32 1.0, %v3500_v24  ;;  %v2078_v47 = vmul.f32 %v3500_v24, %v3999_v61 }
0x12c9   :  { %v2154_v31 = vadd.f32 1.0, %v3502_v29 }
0x12cb   :  { %3503 = vrcp.f32 %v2154_v31 }
0x12d5   :  { %v3504_v32 = vpop.eup %3503 }
0x12d6   :  { %v2169_v51 = vsub.f32 1.0, %v3504_v32  ;;  %v2175_v54 = vmul.f32 %v3504_v32, %v4004_v5 }
0x1302   :  { %v2063_v25 = vpop.permute.xlu0 %2062 }
0x1303   :  { %v2065_v27 = vmul.f32 %v3500_v24, %v2063_v25 }
0x1305   :  { %2067 = vrot.lane.b32.xlu0 %v2065_v27, %s3536_s23 }
0x1326   :  { %v2160_v3 = vpop.permute.xlu1 %2159 }
0x1327   :  { %v2162_v33 = vmul.f32 %v3504_v32, %v2160_v3  ;;  %v2636_v3 = vld [vmem:[%s4141_s11] sm:$0xff] }
0x1329   :  { %2164 = vrot.lane.b32.xlu1 %v2162_v33, %s3536_s23  ;;  %v2637_v33 = vld [vmem:[%s4141_s11 + $0x8] sm:$0xff] }
0x1377   :  { %v2068_v36 = vpop.permute.xlu0 %2067 }
0x1378   :  { %v2070_v37 = vadd.f32 %v2068_v36, %v1975_v20  ;;  %v3417_v36 = vpack.c.bf16 %v2637_v33, %v2636_v3 }
0x137a   :  { %3505 = vtanh.f32 %v2070_v37  ;;  %v2638_v37 = vld [vmem:[%s4141_s11 + $0x10] sm:$0xff] }
0x1384   :  { %v3506_v40 = vpop.eup %3505 }
0x1385   :  { %2074 = vrot.lane.b32.xlu0 %v3506_v40, %s3538_s7  ;;  %v2639_v40 = vld [vmem:[%s4141_s11 + $0x18] sm:$0xff] }
0x139b   :  { %v2165_v43 = vpop.permute.xlu1 %2164 }
0x139c   :  { %v2167_v44 = vadd.f32 %v2165_v43, %v3728_v11 }
0x139e   :  { %3507 = vtanh.f32 %v2167_v44  ;;  %v3420_v44 = vpack.c.bf16 %v2639_v40, %v2638_v37 }
0x13a8   :  { %v3508_v62 = vpop.eup %3507 }
0x13a9   :  { %2171 = vrot.lane.b32.xlu1 %v3508_v62, %s3538_s7 }
0x13f7   :  { %v2075_v46 = vpop.permute.xlu0 %2074 }
0x13f8   :  { %v2077_v48 = vmul.f32 %v2075_v46, %v2072_v41 }
0x13fa   :  { %v4041_v50 = vadd.f32 %v2078_v47, %v2077_v48 }
0x13fc   :  { %2253 = vrot.lane.b32.xlu0 %v4041_v50, %s3538_s7 }
0x141b   :  { %v2172_v52 = vpop.permute.xlu1 %2171 }
0x141c   :  { %v2174_v55 = vmul.f32 %v2172_v52, %v2169_v51 }
0x141e   :  { %v4046_v11 = vadd.f32 %v2175_v54, %v2174_v55 }
0x1420   :  { %2178 = vrot.lane.b32.xlu1 %v4046_v11, %s3538_s7 }
0x146e   :  { %v2254_v57 = vpop.permute.xlu0 %2253 }
0x146f   :  { %3218 = vmatmul.mubr.msk.f32.vlgmr.msra.gmra.mrb[28].mxu1 %vm422_vm12, %v2254_v57 }
0x1470   :  { %3406 = vmatpush3.bf16.msra.mxu1 %v3756_v34  ;;  %3239 = vmatprep.mubr.msk.f32.mxu1 %vm3535_vm10, %v3533_v17 }
0x1471   :  { %3407 = vmatprep.subr.bf16.mxu1 %v3534_v35 }
0x1474   :  { %3409 = vmatpush3.bf16.msra.mxu1 %v3769_v39 }
0x1475   :  { %3416 = vmatprep.subr.bf16.mxu1 %v3534_v35 }
0x1492   :  { %v2179_v58 = vpop.permute.xlu1 %2178 }
0x1493   :  { %3207 = vmatmul.mubr.msk.f32.vlgmr.msra.gmra.mrb[26].mxu0 %vm422_vm12, %v2179_v58 }
0x1494   :  { %3400 = vmatpush3.bf16.msra.mxu0 %v3683_v42  ;;  %3228 = vmatprep.mubr.msk.f32.mxu0 %vm3535_vm10, %v3533_v17 }
0x1495   :  { %3401 = vmatprep.subr.bf16.mxu0 %v3534_v35 }
0x1498   :  { %3403 = vmatpush3.bf16.msra.mxu0 %v3694_v49 }
0x1499   :  { %3410 = vmatprep.subr.bf16.mxu0 %v3534_v35 }
0x149b   :  { %3229 = vmatmul.mubr.msk.f32.vlgmr.msra.gmra.mrb[28].mxu0 %vm422_vm12, %v2179_v58 }
0x149c   :  { %3412 = vmatpush3.bf16.msra.mxu0 %v3745_v30  ;;  %3250 = vmatprep.mubr.msk.f32.mxu0 %vm3535_vm10, %v3533_v17 }
0x149d   :  { %3413 = vmatprep.subr.bf16.mxu0 %v3534_v35 }
0x14a0   :  { %3415 = vmatpush3.bf16.msra.mxu0 %v3765_v38 }
0x1542   :  { %v2323_v42 = vpop.f32.mrb[28].mxu1 }
0x1543   :  { %v2334_v34 = vadd.f32 %v2323_v42, %v3795_v53  ;;  %v3219_v39 = vpop.f32.mrb[29].mxu1 }
0x1545   :  { %2336 = vrot.lane.b32.xlu0 %v2334_v34, %s3536_s23 }
0x1566   :  { %v2248_v49 = vpop.f32.mrb[26].mxu0 }
0x1567   :  { %v3208_v59 = vpop.f32.mrb[27].mxu0  ;;  %v2249_v30 = vadd.f32 %v3816_v56, %v2248_v49 }
0x1569   :  { %v2327_v0 = vadd.f32 %v2323_v42, %v2249_v30 }
0x156b   :  { %v2800_v2 = vmul.f32 -1.442695, %v2327_v0 }
0x156d   :  { %3509 = vpow2.f32 %v2800_v2 }
0x156e   :  { %v2420_v60 = vpop.f32.mrb[28].mxu0 }
0x156f   :  { %v2431_v61 = vadd.f32 %v2420_v60, %v3730_v12  ;;  %v3230_v63 = vpop.f32.mrb[29].mxu0  ;;  %v2424_v10 = vadd.f32 %v2420_v60, %v3726_v9 }
0x1571   :  { %2433 = vrot.lane.b32.xlu1 %v2431_v61, %s3536_s23  ;;  %v2802_v13 = vmul.f32 -1.442695, %v2424_v10 }
0x1577   :  { %v3510_v38 = vpop.eup %3509 }
0x1578   :  { %v2331_v4 = vadd.f32 1.0, %v3510_v38 }
0x157a   :  { %3511 = vrcp.f32 %v2331_v4 }
0x157b   :  { %3513 = vpow2.f32 %v2802_v13 }
0x1584   :  { %v3512_v5 = vpop.eup %3511 }
0x1585   :  { %v3514_v12 = vpop.eup %3513  ;;  %v2346_v23 = vsub.f32 1.0, %v3512_v5  ;;  %v2352_v24 = vmul.f32 %v3512_v5, %v4041_v50  ;;  %v2807_v50 = vld [vmem:[%s4143_s12] ss:$0 sm:$0xff] }
0x1586   :  { %v2428_v14 = vadd.f32 1.0, %v3514_v12 }
0x1588   :  { %3515 = vrcp.f32 %v2428_v14 }
0x1592   :  { %v3516_v15 = vpop.eup %3515 }
0x1593   :  { %v2443_v27 = vsub.f32 1.0, %v3516_v15  ;;  %v2449_v29 = vmul.f32 %v3516_v15, %v4046_v11 }
0x15b7   :  { %v2337_v6 = vpop.permute.xlu0 %2336 }
0x15b8   :  { %v2339_v8 = vmul.f32 %v3512_v5, %v2337_v6 }
0x15ba   :  { %2341 = vrot.lane.b32.xlu0 %v2339_v8, %s3536_s23 }
0x15e3   :  { %v2434_v56 = vpop.permute.xlu1 %2433 }
0x15e4   :  { %v2436_v16 = vmul.f32 %v3516_v15, %v2434_v56 }
0x15e6   :  { %2438 = vrot.lane.b32.xlu1 %v2436_v16, %s3536_s23 }
0x162c   :  { %v2342_v18 = vpop.permute.xlu0 %2341 }
0x162d   :  { %v2344_v7 = vadd.f32 %v2342_v18, %v2249_v30 }
0x162f   :  { %3517 = vtanh.f32 %v2344_v7 }
0x1639   :  { %v3518_v19 = vpop.eup %3517 }
0x163a   :  { %2348 = vrot.lane.b32.xlu0 %v3518_v19, %s3538_s7 }
0x1658   :  { %v2439_v20 = vpop.permute.xlu1 %2438 }
0x1659   :  { %v2441_v21 = vadd.f32 %v2439_v20, %v3726_v9 }
0x165b   :  { %3519 = vtanh.f32 %v2441_v21 }
0x1665   :  { %v3520_v22 = vpop.eup %3519 }
0x1666   :  { %2445 = vrot.lane.b32.xlu1 %v3520_v22, %s3538_s7 }
0x16ac   :  { %v2349_v1 = vpop.permute.xlu0 %2348 }
0x16ad   :  { %v2351_v25 = vmul.f32 %v2349_v1, %v2346_v23 }
0x16af   :  { %v4082_v26 = vadd.f32 %v2352_v24, %v2351_v25 }
0x16b1   :  { %2527 = vrot.lane.b32.xlu0 %v4082_v26, %s3538_s7 }
0x16d8   :  { %v2446_v28 = vpop.permute.xlu1 %2445 }
0x16d9   :  { %v2448_v31 = vmul.f32 %v2446_v28, %v2443_v27 }
0x16db   :  { %v2450_v9 = vadd.f32 %v2449_v29, %v2448_v31 }
0x16dd   :  { %2452 = vrot.lane.b32.xlu1 %v2450_v9, %s3538_s7 }
0x1723   :  { %v2528_v32 = vpop.permute.xlu0 %2527 }
0x1724   :  { %3251 = vmatmul.mubr.msk.f32.vlgmr.msra.gmra.mrb[30].mxu0 %vm422_vm12, %v2528_v32 }
0x174f   :  { %v2453_v43 = vpop.permute.xlu1 %2452 }
0x1750   :  { %2629 = vst.msk [vmem:[%s4142_s14] sm:$0xff] %vm422_vm12, %v2453_v43  ;;  %3240 = vmatmul.mubr.msk.f32.vlgmr.msra.gmra.mrb[30].mxu1 %vm422_vm12, %v2453_v43 }
0x1751   :  { %3418 = vmatpush3.bf16.msra.mxu1 %v3417_v36  ;;  %3261 = vmatprep.mubr.msk.f32.mxu1 %vm3535_vm10, %v3533_v17 }
0x1752   :  { %3419 = vmatprep.subr.bf16.mxu1 %v3534_v35  ;;  %v3531_v35 = vld [vmem:[%s4140_s9] ss:$0 sm:$0xff] }
0x1755   :  { %3421 = vmatpush3.bf16.msra.mxu1 %v3420_v44 }
0x1758   :  { %3262 = vmatmul.mubr.msk.f32.vlgmr.msra.gmra.mrb[32].mxu1 %vm422_vm12, %v3842_v45 }
0x17f7   :  { %v2597_v62 = vpop.f32.mrb[30].mxu0 }
0x17f8   :  { %v2608_v41 = vadd.f32 %v2597_v62, %v3795_v53  ;;  %v3252_v46 = vpop.f32.mrb[31].mxu0 }
0x17fa   :  { %2610 = vrot.lane.b32.xlu0 %v2608_v41, %s3536_s23 }
0x1823   :  { %v2522_v47 = vpop.f32.mrb[30].mxu1 }
0x1824   :  { %v3241_v48 = vpop.f32.mrb[31].mxu1  ;;  %v2523_v45 = vadd.f32 %v3531_v35, %v2522_v47 }
0x1826   :  { %v2601_v54 = vadd.f32 %v2597_v62, %v2523_v45 }
0x1828   :  { %v2805_v53 = vmul.f32 -1.442695, %v2601_v54 }
0x182a   :  { %3521 = vpow2.f32 %v2805_v53 }
0x182b   :  { %v2713_v51 = vpop.f32.mrb[32].mxu1 }
0x182c   :  { %v2714_v17 = vadd.f32 %v2807_v50, %v2713_v51  ;;  %v3263_v52 = vpop.f32.mrb[33].mxu1 }
0x182e   :  { %2717 = vmax.xlane.f32.xlu0 %v2714_v17 }
0x1834   :  { %v3522_v55 = vpop.eup %3521 }
0x1835   :  { %v2605_v11 = vadd.f32 1.0, %v3522_v55 }
0x1837   :  { %3523 = vrcp.f32 %v2605_v11 }
0x1841   :  { %v3524_v57 = vpop.eup %3523 }
0x1842   :  { %v2620_v30 = vsub.f32 1.0, %v3524_v57  ;;  %v2626_v2 = vmul.f32 %v3524_v57, %v4082_v26 }
0x186c   :  { %v2611_v58 = vpop.permute.xlu0 %2610 }
0x186d   :  { %v2613_v42 = vmul.f32 %v3524_v57, %v2611_v58 }
0x186f   :  { %2615 = vrot.lane.b32.xlu1 %v2613_v42, %s3536_s23 }
0x18bb   :  { %v2718_v59 = vpop.xlane.xlu0 %2717 }
0x18bc   :  { %v2719_v60 = vsub.f32 %v2714_v17, %v2718_v59 }
0x18be   :  { %v2720_v61 = vmul.f32 1.442695, %v2719_v60 }
0x18e1   :  { %v2616_v34 = vpop.permute.xlu1 %2615 }
0x18e2   :  { %v2618_v39 = vadd.f32 %v2616_v34, %v2523_v45 }
0x18e4   :  { %3525 = vtanh.f32 %v2618_v39 }
0x18e5   :  { %3527 = vpow2.f32 %v2720_v61 }
0x18ee   :  { %v3526_v49 = vpop.eup %3525 }
0x18ef   :  { %2622 = vrot.lane.b32.xlu1 %v3526_v49, %s3538_s7  ;;  %v3528_v63 = vpop.eup %3527 }
0x1913   :  { %2722 = vadd.xlane.f32.xlu1 %v3528_v63 }
0x1961   :  { %v2623_v0 = vpop.permute.xlu1 %2622 }
0x1962   :  { %v2625_v38 = vmul.f32 %v2623_v0, %v2620_v30 }
0x1964   :  { %v2627_v4 = vadd.f32 %v2626_v2, %v2625_v38 }
0x1966   :  { %2631 = vrot.lane.b32.xlu0 %v2627_v4, %s3538_s7 }
0x19a0   :  { %v2723_v5 = vpop.xlane.xlu1 %2722 }
0x19a1   :  { %3529 = vlog2.f32 %v2723_v5 }
0x19ab   :  { %v3530_v6 = vpop.eup %3529 }
0x19ac   :  { %v2725_v8 = vmul.f32 0.6931472, %v3530_v6 }
0x19ae   :  { %v2726_v10 = vsub.f32 %v2719_v60, %v2725_v8 }
0x19b0   :  { %2727 = vst [vmem:[%s4144_s13] sm:$0xff] %v2726_v10 }
0x19d8   :  { %v2632_v13 = vpop.permute.xlu0 %2631 }
0x19d9   :  { %2806 = vst.msk [vmem:[%s4142_s14 + $0x8] sm:$0xff] %vm422_vm12, %v2632_v13 }

</bundles_post_ra>
